<compile_context>
chip_gen: v5e
topology: v5e:2x2
jax: 0.10.0
libtpu: 0.0.40
codegen_flags: <defaults>
</compile_context>

<pallas_src>
import functools

import jax
import jax.numpy as jnp
from jax.experimental import pallas as pl
from jax.experimental.pallas import tpu as pltpu

NEG_SLOPE = 0.2   # GraphLayer default negative_slope
BN_EPS = 1e-5     # nn.BatchNorm1d default eps


def _pick_tb(B, N):
    """Largest windows-per-step TB such that TB | B, the grid keeps >= 2 steps
    (v7x has 2 TensorCores), and the unrolled per-step work stays moderate."""
    best = 1
    for tb in range(1, B + 1):
        if B % tb:
            continue
        if B // tb < min(2, B):
            continue
        if tb * N > 512:
            continue
        best = tb
    return best


def _make_kernel(TB, N, F_in, C, H, return_attention):
    HC = H * C

    def kernel(x_ref, mask_ref, emb_ref, w_lin_ref, att_x_ref, att_e_ref,
               vec_ref, w_ff_ref, *out_refs):
        if return_attention:
            out_ref, attn_ref = out_refs
        else:
            (out_ref,) = out_refs
            attn_ref = None

        x = x_ref[...]                      # (TB*N, F_in) bf16
        mask_bias = mask_ref[...]           # (N, N) f32: 0 on edges, -1e30 off
        emb = emb_ref[...]                  # (N, C)  f32

        # GraphLayer.lin for all TB windows in one MXU call (bf16 ops, f32 acc).
        xw = jnp.dot(x, w_lin_ref[...],
                     preferred_element_type=jnp.float32)                  # (TB*N, HC)
        xw_bf = xw.astype(jnp.bfloat16)     # cast once; reused per head/window

        # Attention logit contributions as two small matmuls (replaces per-head
        # elementwise mul + cross-lane sums on the VPU/XLU):
        #   g_x[:, h] = <xw_h, att_i_h>,   g_x[:, H+h] = <xw_h, att_j_h>
        #   g_e[:, h] = <emb , att_em_i_h>, g_e[:, H+h] = <emb , att_em_j_h>
        g_x = jnp.dot(xw, att_x_ref[...],
                      preferred_element_type=jnp.float32)                 # (TB*N, 2H)
        g_e = jnp.dot(emb, att_e_ref[...],
                      preferred_element_type=jnp.float32)                 # (N, 2H)
        # The j-side broadcasts along rows; one shared sublane->lane transpose
        # serves every window and every head.
        g_x_jT = jnp.transpose(g_x[:, H:])                                # (H, TB*N)
        g_e_jT = jnp.transpose(g_e[:, H:])                                # (H, N)

        bias_gnn = vec_ref[0:1, :]          # (1, HC)  GraphLayer.bias
        b_ff = vec_ref[1:2, :C]
        gamma = vec_ref[2:3, :C]
        beta = vec_ref[3:4, :C]

        window_rows = []
        for w in range(TB):
            r0 = w * N
            head_outs = []
            for h in range(H):
                g_i = g_x[r0:r0 + N, h:h + 1] + g_e[:, h:h + 1]          # (N, 1)
                g_j = g_x_jT[h:h + 1, r0:r0 + N] + g_e_jT[h:h + 1, :]    # (1, N)
                s = g_i + g_j                                            # (N, N)
                s = jnp.where(s > 0, s, NEG_SLOPE * s)                   # leaky_relu(0.2)
                s = s + mask_bias                                        # mask off-edges
                # Masked softmax over source nodes j. Self-loops are always
                # added, so every row has >=1 unmasked entry; the clamp below
                # is only a division guard (an all-masked row cannot occur).
                m = jnp.max(s, axis=-1, keepdims=True)
                p = jnp.exp(s - m)
                alpha = p / jnp.maximum(jnp.sum(p, axis=-1, keepdims=True), 1e-30)
                if return_attention:
                    attn_ref[w, h] = alpha.astype(attn_ref.dtype)        # bf16 debug out
                # Aggregation on the MXU (bf16 operands, f32 acc).
                # TODO(synk): for H > 1 with C not a multiple of 128, pad each
                # head's lane slice of w_lin/xw to avoid a relayout here.
                head_outs.append(jnp.dot(
                    alpha.astype(jnp.bfloat16),
                    xw_bf[r0:r0 + N, h * C:(h + 1) * C],
                    preferred_element_type=jnp.float32))                 # (N, C)
            window_rows.append(head_outs[0] if H == 1
                               else jnp.concatenate(head_outs, axis=-1))
        gnn_out = (window_rows[0] if TB == 1
                   else jnp.concatenate(window_rows, axis=0)) + bias_gnn  # (TB*N, HC)

        # GNNLayer.ff : one MXU matmul covering all TB windows.
        y = jnp.dot(gnn_out.astype(jnp.bfloat16), w_ff_ref[...],
                    preferred_element_type=jnp.float32) + b_ff            # (TB*N, C)

        # GNNLayer.bn : training-mode BatchNorm1d (biased variance). Each
        # window is a separate module call in GDN, so stats are per window.
        out_rows = []
        for w in range(TB):
            yw = y[w * N:(w + 1) * N, :]
            mean = jnp.mean(yw, axis=0, keepdims=True)
            var = jnp.mean((yw - mean) ** 2, axis=0, keepdims=True)
            y_bn = gamma * (yw - mean) * jax.lax.rsqrt(var + BN_EPS) + beta
            out_rows.append(jnp.maximum(y_bn, 0.0))                       # GNNLayer.relu
        out_ref[...] = out_rows[0] if TB == 1 else jnp.concatenate(out_rows, axis=0)

    return kernel


@functools.partial(jax.jit,
                   static_argnames=("heads", "return_attention", "windows_per_step"))
def gnn_layer_forward(x, adj, emb, params, *, heads, return_attention=False,
                      windows_per_step=None):
    """x: (B, N, F_in) — B independent sliding windows over the same graph."""
    B, N, F_in = x.shape
    C = params["w_ff"].shape[1]
    H = heads
    HC = H * C
    TB = windows_per_step if windows_per_step is not None else _pick_tb(B, N)
    assert B % TB == 0
    steps = B // TB
    f32, bf16 = jnp.float32, jnp.bfloat16

    # ---- operand packing (pure layout plumbing, no padding needed) ----
    x2d = x.astype(bf16).reshape(B * N, F_in)                    # (B*N, F_in)
    mask_bias = jnp.where(adj > 0, 0.0, -1e30).astype(f32)       # (N, N) pre-biased mask
    emb_f = emb.astype(f32)                                      # (N, C)
    w_lin = params["w_lin"].astype(bf16)                         # (F_in, HC)
    w_ff = params["w_ff"].astype(bf16)                           # (HC, C)

    # att_x_cols: block-diagonal (HC, 2H), column h = att_i[h], column H+h = att_j[h]
    att_x_cols = jnp.zeros((HC, 2 * H), f32)
    for h in range(H):
        att_x_cols = att_x_cols.at[h * C:(h + 1) * C, h].set(params["att_i"][h])
        att_x_cols = att_x_cols.at[h * C:(h + 1) * C, H + h].set(params["att_j"][h])
    att_e_cols = jnp.concatenate([params["att_em_i"].T, params["att_em_j"].T],
                                 axis=1).astype(f32)             # (C, 2H)

    vec = jnp.zeros((4, HC), f32)
    vec = vec.at[0, :].set(params["bias_gnn"].reshape(-1))
    vec = vec.at[1, :C].set(params["b_ff"].reshape(-1))
    vec = vec.at[2, :C].set(params["gamma"].reshape(-1))
    vec = vec.at[3, :C].set(params["beta"].reshape(-1))

    # ---- grid / specs ----
    in_specs = [
        pl.BlockSpec((TB * N, F_in), lambda b: (b, 0)),   # x  (per step of TB windows)
        pl.BlockSpec((N, N), lambda b: (0, 0)),           # pre-biased edge mask (resident)
        pl.BlockSpec((N, C), lambda b: (0, 0)),           # emb                 (resident)
        pl.BlockSpec((F_in, HC), lambda b: (0, 0)),       # w_lin               (resident)
        pl.BlockSpec((HC, 2 * H), lambda b: (0, 0)),      # att_x_cols          (resident)
        pl.BlockSpec((C, 2 * H), lambda b: (0, 0)),       # att_e_cols          (resident)
        pl.BlockSpec((4, HC), lambda b: (0, 0)),          # packed bias/bn vectors
        pl.BlockSpec((HC, C), lambda b: (0, 0)),          # w_ff                (resident)
    ]
    out_spec_main = pl.BlockSpec((TB * N, C), lambda b: (b, 0))
    if return_attention:
        out_shape = (jax.ShapeDtypeStruct((B * N, C), f32),
                     jax.ShapeDtypeStruct((B, H, N, N), bf16))
        out_specs = (out_spec_main,
                     pl.BlockSpec((TB, H, N, N), lambda b: (b, 0, 0, 0)))
    else:
        out_shape = jax.ShapeDtypeStruct((B * N, C), f32)
        out_specs = out_spec_main

    # ---- advisory cost estimate ----
    mm_flops_step = (2 * TB * N * F_in * HC          # lin
                     + 2 * TB * N * HC * 2 * H       # logits (xw side)
                     + 2 * N * C * 2 * H             # logits (emb side)
                     + TB * H * 2 * N * N * C        # aggregation
                     + 2 * TB * N * HC * C)          # ff
    vpu_flops_step = TB * H * 8 * N * N + TB * 12 * N * C
    bytes_const = (mask_bias.size * 4 + emb_f.size * 4 + w_lin.size * 2
                   + att_x_cols.size * 4 + att_e_cols.size * 4 + vec.size * 4
                   + w_ff.size * 2)
    bytes_step = TB * N * F_in * 2 + TB * N * C * 4
    if return_attention:
        bytes_step += TB * H * N * N * 2
    cost = pl.CostEstimate(flops=steps * (mm_flops_step + vpu_flops_step),
                           transcendentals=steps * (TB * H * N * N + TB * N),
                           bytes_accessed=bytes_const + steps * bytes_step)

    kernel = _make_kernel(TB, N, F_in, C, H, return_attention)
    result = pl.pallas_call(
        kernel,
        out_shape=out_shape,
        grid=(steps,),
        in_specs=in_specs,
        out_specs=out_specs,
        compiler_params=pltpu.CompilerParams(
            dimension_semantics=("parallel",)),       # v7x: shard steps over both TCs
        cost_estimate=cost,
    )(x2d, mask_bias, emb_f, w_lin, att_x_cols, att_e_cols, vec, w_ff)

    if return_attention:
        out2d, attn = result
        return out2d.reshape(B, N, C), attn
    return result.reshape(B, N, C)


def edge_index_to_dense_adj(edge_index, num_nodes):
    """remove_self_loops + add_self_loops, densified: adj[dst, src] = 1."""
    src, dst = edge_index[0], edge_index[1]
    keep = (src != dst).astype(jnp.float32)
    adj = jnp.zeros((num_nodes, num_nodes), jnp.float32)
    adj = adj.at[dst, src].set(keep)
    diag = jnp.arange(num_nodes)
    adj = adj.at[diag, diag].set(1.0)
    return adj


def init_params(key, in_channel, out_channel, heads):
    ks = jax.random.split(key, 8)
    C, H = out_channel, heads
    scale = 0.1
    return {
        # GraphLayer.lin : Linear(in_channel, heads*out_channel, bias=False)
        "w_lin": scale * jax.random.normal(ks[0], (in_channel, H * C), jnp.float32),
        # att_i / att_j / att_em_i / att_em_j : (1, heads, out_channel) -> stored (H, C)
        "att_i": scale * jax.random.normal(ks[1], (H, C), jnp.float32),
        "att_j": scale * jax.random.normal(ks[2], (H, C), jnp.float32),
        "att_em_i": scale * jax.random.normal(ks[3], (H, C), jnp.float32),
        "att_em_j": scale * jax.random.normal(ks[4], (H, C), jnp.float32),
        # GraphLayer.bias : (heads*out_channel,)
        "bias_gnn": scale * jax.random.normal(ks[5], (1, H * C), jnp.float32),
        # GNNLayer.ff : Linear(heads*out_channel, out_channel)
        "w_ff": scale * jax.random.normal(ks[6], (H * C, C), jnp.float32),
        "b_ff": scale * jax.random.normal(ks[7], (1, C), jnp.float32),
        # GNNLayer.bn affine params (default init)
        "gamma": jnp.ones((1, C), jnp.float32),
        "beta": jnp.zeros((1, C), jnp.float32),
    }


def _reference_forward(x, adj, emb, params, heads):
    """Pure-JAX reference for one window, mimicking the kernel's bf16 MXU casts."""
    C = params["w_ff"].shape[1]
    H = heads
    xw = jnp.dot(x.astype(jnp.bfloat16), params["w_lin"].astype(jnp.bfloat16),
                 preferred_element_type=jnp.float32)
    head_outs, attn = [], []
    for h in range(H):
        xw_h = xw[:, h * C:(h + 1) * C]
        g_i = jnp.sum(xw_h * params["att_i"][h] + emb * params["att_em_i"][h],
                      axis=-1, keepdims=True)
        g_j = jnp.sum(xw_h * params["att_j"][h] + emb * params["att_em_j"][h],
                      axis=-1, keepdims=True)
        s = g_i + g_j.T
        s = jnp.where(s > 0, s, NEG_SLOPE * s)
        s = jnp.where(adj > 0, s, -1e30)
        m = jnp.max(s, axis=-1, keepdims=True)
        p = jnp.exp(s - m)
        alpha = p / jnp.maximum(jnp.sum(p, axis=-1, keepdims=True), 1e-30)
        attn.append(alpha)
        head_outs.append(jnp.dot(alpha.astype(jnp.bfloat16),
                                 xw_h.astype(jnp.bfloat16),
                                 preferred_element_type=jnp.float32))
    gnn_out = jnp.concatenate(head_outs, axis=-1) + params["bias_gnn"]
    y = jnp.dot(gnn_out.astype(jnp.bfloat16), params["w_ff"].astype(jnp.bfloat16),
                preferred_element_type=jnp.float32) + params["b_ff"]
    mean = jnp.mean(y, axis=0, keepdims=True)
    var = jnp.mean((y - mean) ** 2, axis=0, keepdims=True)
    y_bn = params["gamma"] * (y - mean) * jax.lax.rsqrt(var + BN_EPS) + params["beta"]
    return jnp.maximum(y_bn, 0.0), jnp.stack(attn, axis=0)


if __name__ == "__main__":
    B = 8             # batch of sliding windows (grid axis; TB windows per grid step)
    N = 16            # number of graph nodes
    in_channel = 32   # input feature dim (sliding-window length in GDN)
    out_channel = 32  # GNN hidden dim; embedding dim must equal this in GraphLayer
    heads = 1         # GDN uses heads=1

    key = jax.random.PRNGKey(0)
    k_x, k_emb, k_par = jax.random.split(key, 3)

    x = jax.random.normal(k_x, (B, N, in_channel), jnp.float32)
    embedding = jax.random.normal(k_emb, (N, out_channel), jnp.float32)

    # deterministic directed edge_index (2, E): each node receives from (i+1)%N, (i+5)%N
    dst = jnp.tile(jnp.arange(N, dtype=jnp.int32), 2)
    src = jnp.concatenate([(jnp.arange(N, dtype=jnp.int32) + 1) % N,
                           (jnp.arange(N, dtype=jnp.int32) + 5) % N])
    edge_index = jnp.stack([src, dst], axis=0)          # (2, 32)
    adj = edge_index_to_dense_adj(edge_index, N)        # glue (plain JAX)

    params = init_params(k_par, in_channel, out_channel, heads)

    # debug path: also materializes the dense per-head attention weights (bf16)
    out_dbg, attn = gnn_layer_forward(x, adj, embedding, params,
                                      heads=heads, return_attention=True)
    # production path: attention write-back (the largest HBM transfer) dropped
    out = gnn_layer_forward(x, adj, embedding, params,
                            heads=heads, return_attention=False)
    out = jax.block_until_ready(out)
    attn = jax.block_until_ready(attn)
    out_dbg = jax.block_until_ready(out_dbg)

    assert out.shape == (B, N, out_channel)
    assert attn.shape == (B, heads, N, N)
    assert bool(jnp.all(out >= 0.0))                    # ReLU output
    assert bool(jnp.all(jnp.isfinite(out)))
    # attention rows over the active edge set must sum to ~1 (attn stored in bf16)
    attn_f32 = attn.astype(jnp.float32)
    assert bool(jnp.allclose(jnp.sum(attn_f32, axis=-1), 1.0, atol=2e-2))
    # with/without-attention paths must agree
    assert bool(jnp.allclose(out, out_dbg, atol=1e-4, rtol=1e-4))

    # pure-JAX reference (same bf16 MXU operand casts)
    ref_out, ref_attn = jax.vmap(
        lambda xb: _reference_forward(xb, adj, embedding, params, heads))(x)
    assert bool(jnp.allclose(out, ref_out, atol=1e-2, rtol=1e-2))
    assert bool(jnp.allclose(attn_f32, ref_attn, atol=1e-2, rtol=1e-2))

    print("KERNEL_OK")
</pallas_src>

<mosaic_0001>
module attributes {stable_mosaic.version = 11 : i64} {
  func.func @kernel(%arg0: i32, %arg1: memref<64x32xbf16, #tpu.memory_space<vmem>>, %arg2: memref<16x16xf32, #tpu.memory_space<vmem>>, %arg3: memref<16x32xf32, #tpu.memory_space<vmem>>, %arg4: memref<32x32xbf16, #tpu.memory_space<vmem>>, %arg5: memref<32x2xf32, #tpu.memory_space<vmem>>, %arg6: memref<32x2xf32, #tpu.memory_space<vmem>>, %arg7: memref<4x32xf32, #tpu.memory_space<vmem>>, %arg8: memref<32x32xbf16, #tpu.memory_space<vmem>>, %arg9: memref<64x32xf32, #tpu.memory_space<vmem>>, %arg10: memref<4x1x16x16xbf16, #tpu.memory_space<vmem>>) attributes {dimension_semantics = [#tpu.dimension_semantics<parallel>], iteration_bounds = array<i64: 2>, scalar_prefetch = 0 : i64, scratch_operands = 0 : i64, tpu.core_type = #tpu.core_type<tc>, window_params = [{transform_indices = @transform_0, window_bounds = array<i64: 64, 32>}, {pipeline_mode = #tpu.pipeline_mode<synchronous>, transform_indices = @transform_1, window_bounds = array<i64: 16, 16>}, {pipeline_mode = #tpu.pipeline_mode<synchronous>, transform_indices = @transform_2, window_bounds = array<i64: 16, 32>}, {pipeline_mode = #tpu.pipeline_mode<synchronous>, transform_indices = @transform_3, window_bounds = array<i64: 32, 32>}, {pipeline_mode = #tpu.pipeline_mode<synchronous>, transform_indices = @transform_4, window_bounds = array<i64: 32, 2>}, {pipeline_mode = #tpu.pipeline_mode<synchronous>, transform_indices = @transform_5, window_bounds = array<i64: 32, 2>}, {pipeline_mode = #tpu.pipeline_mode<synchronous>, transform_indices = @transform_6, window_bounds = array<i64: 4, 32>}, {pipeline_mode = #tpu.pipeline_mode<synchronous>, transform_indices = @transform_7, window_bounds = array<i64: 32, 32>}, {transform_indices = @transform_8, window_bounds = array<i64: 64, 32>}, {transform_indices = @transform_9, window_bounds = array<i64: 4, 1, 16, 16>}]} {
    %c0 = arith.constant 0 : index
    %c0_0 = arith.constant 0 : index
    %0 = vector.load %arg1[%c0, %c0_0] : memref<64x32xbf16, #tpu.memory_space<vmem>>, vector<64x32xbf16>
    %c0_1 = arith.constant 0 : index
    %c0_2 = arith.constant 0 : index
    %1 = vector.load %arg2[%c0_1, %c0_2] : memref<16x16xf32, #tpu.memory_space<vmem>>, vector<16x16xf32>
    %c0_3 = arith.constant 0 : index
    %c0_4 = arith.constant 0 : index
    %2 = vector.load %arg3[%c0_3, %c0_4] : memref<16x32xf32, #tpu.memory_space<vmem>>, vector<16x32xf32>
    %c0_5 = arith.constant 0 : index
    %c0_6 = arith.constant 0 : index
    %3 = vector.load %arg4[%c0_5, %c0_6] : memref<32x32xbf16, #tpu.memory_space<vmem>>, vector<32x32xbf16>
    %cst = arith.constant dense<0.000000e+00> : vector<64x32xf32>
    %4 = tpu.matmul %0, %3, %cst {dimension_numbers = #tpu.dot_dimension_numbers<[1], [0], [0], [1], [0, 0, 1, 1], [], []>} : vector<64x32xbf16>, vector<32x32xbf16>, vector<64x32xf32> -> vector<64x32xf32>
    %5 = arith.truncf %4 : vector<64x32xf32> to vector<64x32xbf16>
    %c0_7 = arith.constant 0 : index
    %c0_8 = arith.constant 0 : index
    %6 = vector.load %arg5[%c0_7, %c0_8] : memref<32x2xf32, #tpu.memory_space<vmem>>, vector<32x2xf32>
    %cst_9 = arith.constant dense<0.000000e+00> : vector<64x2xf32>
    %7 = tpu.matmul %4, %6, %cst_9 {dimension_numbers = #tpu.dot_dimension_numbers<[1], [0], [0], [1], [0, 0, 1, 1], [], []>} : vector<64x32xf32>, vector<32x2xf32>, vector<64x2xf32> -> vector<64x2xf32>
    %c0_10 = arith.constant 0 : index
    %c0_11 = arith.constant 0 : index
    %8 = vector.load %arg6[%c0_10, %c0_11] : memref<32x2xf32, #tpu.memory_space<vmem>>, vector<32x2xf32>
    %cst_12 = arith.constant dense<0.000000e+00> : vector<16x2xf32>
    %9 = tpu.matmul %2, %8, %cst_12 {dimension_numbers = #tpu.dot_dimension_numbers<[1], [0], [0], [1], [0, 0, 1, 1], [], []>} : vector<16x32xf32>, vector<32x2xf32>, vector<16x2xf32> -> vector<16x2xf32>
    %10 = vector.extract_strided_slice %7 {offsets = [0, 1], sizes = [64, 1], strides = [1, 1]} : vector<64x2xf32> to vector<64x1xf32>
    %11 = tpu.transpose %10, [1, 0] : vector<64x1xf32> -> vector<1x64xf32>
    %12 = vector.extract_strided_slice %9 {offsets = [0, 1], sizes = [16, 1], strides = [1, 1]} : vector<16x2xf32> to vector<16x1xf32>
    %13 = tpu.transpose %12, [1, 0] : vector<16x1xf32> -> vector<1x16xf32>
    %c0_13 = arith.constant 0 : index
    %c0_14 = arith.constant 0 : index
    %14 = vector.load %arg7[%c0_13, %c0_14] : memref<4x32xf32, #tpu.memory_space<vmem>>, vector<1x32xf32>
    %c1 = arith.constant 1 : index
    %c0_15 = arith.constant 0 : index
    %15 = vector.load %arg7[%c1, %c0_15] : memref<4x32xf32, #tpu.memory_space<vmem>>, vector<1x32xf32>
    %c2 = arith.constant 2 : index
    %c0_16 = arith.constant 0 : index
    %16 = vector.load %arg7[%c2, %c0_16] : memref<4x32xf32, #tpu.memory_space<vmem>>, vector<1x32xf32>
    %c3 = arith.constant 3 : index
    %c0_17 = arith.constant 0 : index
    %17 = vector.load %arg7[%c3, %c0_17] : memref<4x32xf32, #tpu.memory_space<vmem>>, vector<1x32xf32>
    %18 = vector.extract_strided_slice %7 {offsets = [0, 0], sizes = [16, 1], strides = [1, 1]} : vector<64x2xf32> to vector<16x1xf32>
    %19 = vector.extract_strided_slice %9 {offsets = [0, 0], sizes = [16, 1], strides = [1, 1]} : vector<16x2xf32> to vector<16x1xf32>
    %20 = arith.addf %18, %19 : vector<16x1xf32>
    %21 = vector.extract_strided_slice %11 {offsets = [0, 0], sizes = [1, 16], strides = [1, 1]} : vector<1x64xf32> to vector<1x16xf32>
    %22 = arith.addf %21, %13 : vector<1x16xf32>
    %23 = vector.broadcast %20 : vector<16x1xf32> to vector<16x16xf32>
    %24 = vector.broadcast %22 : vector<1x16xf32> to vector<16x16xf32>
    %25 = arith.addf %23, %24 : vector<16x16xf32>
    %cst_18 = arith.constant 0.000000e+00 : f32
    %26 = vector.broadcast %cst_18 : f32 to vector<16x16xf32>
    %27 = arith.cmpf ogt, %25, %26 : vector<16x16xf32>
    %cst_19 = arith.constant 2.000000e-01 : f32
    %28 = vector.broadcast %cst_19 : f32 to vector<16x16xf32>
    %29 = arith.mulf %28, %25 : vector<16x16xf32>
    %30 = arith.select %27, %25, %29 : vector<16x16xi1>, vector<16x16xf32>
    %31 = arith.addf %30, %1 : vector<16x16xf32>
    %cst_20 = arith.constant dense<0xFF800000> : vector<16xf32>
    %32 = vector.multi_reduction <maximumf>, %31, %cst_20 [1] : vector<16x16xf32> to vector<16xf32>
    %33 = vector.shape_cast %32 : vector<16xf32> to vector<16x1xf32>
    %34 = vector.broadcast %33 : vector<16x1xf32> to vector<16x16xf32>
    %35 = arith.subf %31, %34 : vector<16x16xf32>
    %36 = math.exp %35 : vector<16x16xf32>
    %cst_21 = arith.constant dense<0.000000e+00> : vector<16xf32>
    %37 = vector.multi_reduction <add>, %36, %cst_21 [1] : vector<16x16xf32> to vector<16xf32>
    %38 = vector.shape_cast %37 : vector<16xf32> to vector<16x1xf32>
    %cst_22 = arith.constant 1.000000e-30 : f32
    %39 = vector.broadcast %cst_22 : f32 to vector<16x1xf32>
    %40 = arith.maximumf %38, %39 : vector<16x1xf32>
    %41 = vector.broadcast %40 : vector<16x1xf32> to vector<16x16xf32>
    %42 = arith.divf %36, %41 : vector<16x16xf32>
    %43 = arith.truncf %42 : vector<16x16xf32> to vector<16x16xbf16>
    %c0_23 = arith.constant 0 : index
    %c0_24 = arith.constant 0 : index
    %c0_25 = arith.constant 0 : index
    %c0_26 = arith.constant 0 : index
    %44 = vector.load %arg10[%c0_23, %c0_24, %c0_25, %c0_26] : memref<4x1x16x16xbf16, #tpu.memory_space<vmem>>, vector<1x1x16x16xbf16>
    %45 = vector.shape_cast %44 : vector<1x1x16x16xbf16> to vector<16x16xbf16>
    %46 = vector.shape_cast %43 : vector<16x16xbf16> to vector<1x1x16x16xbf16>
    tpu.vector_store %arg10[%c0_23, %c0_24, %c0_25, %c0_26], %46 {strides = array<i32>} : memref<4x1x16x16xbf16, #tpu.memory_space<vmem>>, vector<1x1x16x16xbf16>,
    %47 = arith.truncf %42 : vector<16x16xf32> to vector<16x16xbf16>
    %48 = vector.extract_strided_slice %5 {offsets = [0, 0], sizes = [16, 32], strides = [1, 1]} : vector<64x32xbf16> to vector<16x32xbf16>
    %cst_27 = arith.constant dense<0.000000e+00> : vector<16x32xf32>
    %49 = tpu.matmul %47, %48, %cst_27 {dimension_numbers = #tpu.dot_dimension_numbers<[1], [0], [0], [1], [0, 0, 1, 1], [], []>} : vector<16x16xbf16>, vector<16x32xbf16>, vector<16x32xf32> -> vector<16x32xf32>
    %50 = vector.extract_strided_slice %7 {offsets = [16, 0], sizes = [16, 1], strides = [1, 1]} : vector<64x2xf32> to vector<16x1xf32>
    %51 = vector.extract_strided_slice %9 {offsets = [0, 0], sizes = [16, 1], strides = [1, 1]} : vector<16x2xf32> to vector<16x1xf32>
    %52 = arith.addf %50, %51 : vector<16x1xf32>
    %53 = vector.extract_strided_slice %11 {offsets = [0, 16], sizes = [1, 16], strides = [1, 1]} : vector<1x64xf32> to vector<1x16xf32>
    %54 = arith.addf %53, %13 : vector<1x16xf32>
    %55 = vector.broadcast %52 : vector<16x1xf32> to vector<16x16xf32>
    %56 = vector.broadcast %54 : vector<1x16xf32> to vector<16x16xf32>
    %57 = arith.addf %55, %56 : vector<16x16xf32>
    %cst_28 = arith.constant 0.000000e+00 : f32
    %58 = vector.broadcast %cst_28 : f32 to vector<16x16xf32>
    %59 = arith.cmpf ogt, %57, %58 : vector<16x16xf32>
    %cst_29 = arith.constant 2.000000e-01 : f32
    %60 = vector.broadcast %cst_29 : f32 to vector<16x16xf32>
    %61 = arith.mulf %60, %57 : vector<16x16xf32>
    %62 = arith.select %59, %57, %61 : vector<16x16xi1>, vector<16x16xf32>
    %63 = arith.addf %62, %1 : vector<16x16xf32>
    %cst_30 = arith.constant dense<0xFF800000> : vector<16xf32>
    %64 = vector.multi_reduction <maximumf>, %63, %cst_30 [1] : vector<16x16xf32> to vector<16xf32>
    %65 = vector.shape_cast %64 : vector<16xf32> to vector<16x1xf32>
    %66 = vector.broadcast %65 : vector<16x1xf32> to vector<16x16xf32>
    %67 = arith.subf %63, %66 : vector<16x16xf32>
    %68 = math.exp %67 : vector<16x16xf32>
    %cst_31 = arith.constant dense<0.000000e+00> : vector<16xf32>
    %69 = vector.multi_reduction <add>, %68, %cst_31 [1] : vector<16x16xf32> to vector<16xf32>
    %70 = vector.shape_cast %69 : vector<16xf32> to vector<16x1xf32>
    %cst_32 = arith.constant 1.000000e-30 : f32
    %71 = vector.broadcast %cst_32 : f32 to vector<16x1xf32>
    %72 = arith.maximumf %70, %71 : vector<16x1xf32>
    %73 = vector.broadcast %72 : vector<16x1xf32> to vector<16x16xf32>
    %74 = arith.divf %68, %73 : vector<16x16xf32>
    %75 = arith.truncf %74 : vector<16x16xf32> to vector<16x16xbf16>
    %c1_33 = arith.constant 1 : index
    %c0_34 = arith.constant 0 : index
    %c0_35 = arith.constant 0 : index
    %c0_36 = arith.constant 0 : index
    %76 = vector.load %arg10[%c1_33, %c0_34, %c0_35, %c0_36] : memref<4x1x16x16xbf16, #tpu.memory_space<vmem>>, vector<1x1x16x16xbf16>
    %77 = vector.shape_cast %76 : vector<1x1x16x16xbf16> to vector<16x16xbf16>
    %78 = vector.shape_cast %75 : vector<16x16xbf16> to vector<1x1x16x16xbf16>
    tpu.vector_store %arg10[%c1_33, %c0_34, %c0_35, %c0_36], %78 {strides = array<i32>} : memref<4x1x16x16xbf16, #tpu.memory_space<vmem>>, vector<1x1x16x16xbf16>,
    %79 = arith.truncf %74 : vector<16x16xf32> to vector<16x16xbf16>
    %80 = vector.extract_strided_slice %5 {offsets = [16, 0], sizes = [16, 32], strides = [1, 1]} : vector<64x32xbf16> to vector<16x32xbf16>
    %cst_37 = arith.constant dense<0.000000e+00> : vector<16x32xf32>
    %81 = tpu.matmul %79, %80, %cst_37 {dimension_numbers = #tpu.dot_dimension_numbers<[1], [0], [0], [1], [0, 0, 1, 1], [], []>} : vector<16x16xbf16>, vector<16x32xbf16>, vector<16x32xf32> -> vector<16x32xf32>
    %82 = vector.extract_strided_slice %7 {offsets = [32, 0], sizes = [16, 1], strides = [1, 1]} : vector<64x2xf32> to vector<16x1xf32>
    %83 = vector.extract_strided_slice %9 {offsets = [0, 0], sizes = [16, 1], strides = [1, 1]} : vector<16x2xf32> to vector<16x1xf32>
    %84 = arith.addf %82, %83 : vector<16x1xf32>
    %85 = vector.extract_strided_slice %11 {offsets = [0, 32], sizes = [1, 16], strides = [1, 1]} : vector<1x64xf32> to vector<1x16xf32>
    %86 = arith.addf %85, %13 : vector<1x16xf32>
    %87 = vector.broadcast %84 : vector<16x1xf32> to vector<16x16xf32>
    %88 = vector.broadcast %86 : vector<1x16xf32> to vector<16x16xf32>
    %89 = arith.addf %87, %88 : vector<16x16xf32>
    %cst_38 = arith.constant 0.000000e+00 : f32
    %90 = vector.broadcast %cst_38 : f32 to vector<16x16xf32>
    %91 = arith.cmpf ogt, %89, %90 : vector<16x16xf32>
    %cst_39 = arith.constant 2.000000e-01 : f32
    %92 = vector.broadcast %cst_39 : f32 to vector<16x16xf32>
    %93 = arith.mulf %92, %89 : vector<16x16xf32>
    %94 = arith.select %91, %89, %93 : vector<16x16xi1>, vector<16x16xf32>
    %95 = arith.addf %94, %1 : vector<16x16xf32>
    %cst_40 = arith.constant dense<0xFF800000> : vector<16xf32>
    %96 = vector.multi_reduction <maximumf>, %95, %cst_40 [1] : vector<16x16xf32> to vector<16xf32>
    %97 = vector.shape_cast %96 : vector<16xf32> to vector<16x1xf32>
    %98 = vector.broadcast %97 : vector<16x1xf32> to vector<16x16xf32>
    %99 = arith.subf %95, %98 : vector<16x16xf32>
    %100 = math.exp %99 : vector<16x16xf32>
    %cst_41 = arith.constant dense<0.000000e+00> : vector<16xf32>
    %101 = vector.multi_reduction <add>, %100, %cst_41 [1] : vector<16x16xf32> to vector<16xf32>
    %102 = vector.shape_cast %101 : vector<16xf32> to vector<16x1xf32>
    %cst_42 = arith.constant 1.000000e-30 : f32
    %103 = vector.broadcast %cst_42 : f32 to vector<16x1xf32>
    %104 = arith.maximumf %102, %103 : vector<16x1xf32>
    %105 = vector.broadcast %104 : vector<16x1xf32> to vector<16x16xf32>
    %106 = arith.divf %100, %105 : vector<16x16xf32>
    %107 = arith.truncf %106 : vector<16x16xf32> to vector<16x16xbf16>
    %c2_43 = arith.constant 2 : index
    %c0_44 = arith.constant 0 : index
    %c0_45 = arith.constant 0 : index
    %c0_46 = arith.constant 0 : index
    %108 = vector.load %arg10[%c2_43, %c0_44, %c0_45, %c0_46] : memref<4x1x16x16xbf16, #tpu.memory_space<vmem>>, vector<1x1x16x16xbf16>
    %109 = vector.shape_cast %108 : vector<1x1x16x16xbf16> to vector<16x16xbf16>
    %110 = vector.shape_cast %107 : vector<16x16xbf16> to vector<1x1x16x16xbf16>
    tpu.vector_store %arg10[%c2_43, %c0_44, %c0_45, %c0_46], %110 {strides = array<i32>} : memref<4x1x16x16xbf16, #tpu.memory_space<vmem>>, vector<1x1x16x16xbf16>,
    %111 = arith.truncf %106 : vector<16x16xf32> to vector<16x16xbf16>
    %112 = vector.extract_strided_slice %5 {offsets = [32, 0], sizes = [16, 32], strides = [1, 1]} : vector<64x32xbf16> to vector<16x32xbf16>
    %cst_47 = arith.constant dense<0.000000e+00> : vector<16x32xf32>
    %113 = tpu.matmul %111, %112, %cst_47 {dimension_numbers = #tpu.dot_dimension_numbers<[1], [0], [0], [1], [0, 0, 1, 1], [], []>} : vector<16x16xbf16>, vector<16x32xbf16>, vector<16x32xf32> -> vector<16x32xf32>
    %114 = vector.extract_strided_slice %7 {offsets = [48, 0], sizes = [16, 1], strides = [1, 1]} : vector<64x2xf32> to vector<16x1xf32>
    %115 = vector.extract_strided_slice %9 {offsets = [0, 0], sizes = [16, 1], strides = [1, 1]} : vector<16x2xf32> to vector<16x1xf32>
    %116 = arith.addf %114, %115 : vector<16x1xf32>
    %117 = vector.extract_strided_slice %11 {offsets = [0, 48], sizes = [1, 16], strides = [1, 1]} : vector<1x64xf32> to vector<1x16xf32>
    %118 = arith.addf %117, %13 : vector<1x16xf32>
    %119 = vector.broadcast %116 : vector<16x1xf32> to vector<16x16xf32>
    %120 = vector.broadcast %118 : vector<1x16xf32> to vector<16x16xf32>
    %121 = arith.addf %119, %120 : vector<16x16xf32>
    %cst_48 = arith.constant 0.000000e+00 : f32
    %122 = vector.broadcast %cst_48 : f32 to vector<16x16xf32>
    %123 = arith.cmpf ogt, %121, %122 : vector<16x16xf32>
    %cst_49 = arith.constant 2.000000e-01 : f32
    %124 = vector.broadcast %cst_49 : f32 to vector<16x16xf32>
    %125 = arith.mulf %124, %121 : vector<16x16xf32>
    %126 = arith.select %123, %121, %125 : vector<16x16xi1>, vector<16x16xf32>
    %127 = arith.addf %126, %1 : vector<16x16xf32>
    %cst_50 = arith.constant dense<0xFF800000> : vector<16xf32>
    %128 = vector.multi_reduction <maximumf>, %127, %cst_50 [1] : vector<16x16xf32> to vector<16xf32>
    %129 = vector.shape_cast %128 : vector<16xf32> to vector<16x1xf32>
    %130 = vector.broadcast %129 : vector<16x1xf32> to vector<16x16xf32>
    %131 = arith.subf %127, %130 : vector<16x16xf32>
    %132 = math.exp %131 : vector<16x16xf32>
    %cst_51 = arith.constant dense<0.000000e+00> : vector<16xf32>
    %133 = vector.multi_reduction <add>, %132, %cst_51 [1] : vector<16x16xf32> to vector<16xf32>
    %134 = vector.shape_cast %133 : vector<16xf32> to vector<16x1xf32>
    %cst_52 = arith.constant 1.000000e-30 : f32
    %135 = vector.broadcast %cst_52 : f32 to vector<16x1xf32>
    %136 = arith.maximumf %134, %135 : vector<16x1xf32>
    %137 = vector.broadcast %136 : vector<16x1xf32> to vector<16x16xf32>
    %138 = arith.divf %132, %137 : vector<16x16xf32>
    %139 = arith.truncf %138 : vector<16x16xf32> to vector<16x16xbf16>
    %c3_53 = arith.constant 3 : index
    %c0_54 = arith.constant 0 : index
    %c0_55 = arith.constant 0 : index
    %c0_56 = arith.constant 0 : index
    %140 = vector.load %arg10[%c3_53, %c0_54, %c0_55, %c0_56] : memref<4x1x16x16xbf16, #tpu.memory_space<vmem>>, vector<1x1x16x16xbf16>
    %141 = vector.shape_cast %140 : vector<1x1x16x16xbf16> to vector<16x16xbf16>
    %142 = vector.shape_cast %139 : vector<16x16xbf16> to vector<1x1x16x16xbf16>
    tpu.vector_store %arg10[%c3_53, %c0_54, %c0_55, %c0_56], %142 {strides = array<i32>} : memref<4x1x16x16xbf16, #tpu.memory_space<vmem>>, vector<1x1x16x16xbf16>,
    %143 = arith.truncf %138 : vector<16x16xf32> to vector<16x16xbf16>
    %144 = vector.extract_strided_slice %5 {offsets = [48, 0], sizes = [16, 32], strides = [1, 1]} : vector<64x32xbf16> to vector<16x32xbf16>
    %cst_57 = arith.constant dense<0.000000e+00> : vector<16x32xf32>
    %145 = tpu.matmul %143, %144, %cst_57 {dimension_numbers = #tpu.dot_dimension_numbers<[1], [0], [0], [1], [0, 0, 1, 1], [], []>} : vector<16x16xbf16>, vector<16x32xbf16>, vector<16x32xf32> -> vector<16x32xf32>
    %146 = tpu.concatenate %49, %81, %113, %145 in 0 : vector<16x32xf32>, vector<16x32xf32>, vector<16x32xf32>, vector<16x32xf32> -> vector<64x32xf32>
    %147 = vector.broadcast %14 : vector<1x32xf32> to vector<64x32xf32>
    %148 = arith.addf %146, %147 : vector<64x32xf32>
    %149 = arith.truncf %148 : vector<64x32xf32> to vector<64x32xbf16>
    %c0_58 = arith.constant 0 : index
    %c0_59 = arith.constant 0 : index
    %150 = vector.load %arg8[%c0_58, %c0_59] : memref<32x32xbf16, #tpu.memory_space<vmem>>, vector<32x32xbf16>
    %cst_60 = arith.constant dense<0.000000e+00> : vector<64x32xf32>
    %151 = tpu.matmul %149, %150, %cst_60 {dimension_numbers = #tpu.dot_dimension_numbers<[1], [0], [0], [1], [0, 0, 1, 1], [], []>} : vector<64x32xbf16>, vector<32x32xbf16>, vector<64x32xf32> -> vector<64x32xf32>
    %152 = vector.broadcast %15 : vector<1x32xf32> to vector<64x32xf32>
    %153 = arith.addf %151, %152 : vector<64x32xf32>
    %154 = vector.extract_strided_slice %153 {offsets = [0, 0], sizes = [16, 32], strides = [1, 1]} : vector<64x32xf32> to vector<16x32xf32>
    %cst_61 = arith.constant dense<0.000000e+00> : vector<32xf32>
    %155 = vector.multi_reduction <add>, %154, %cst_61 [0] : vector<16x32xf32> to vector<32xf32>
    %156 = vector.shape_cast %155 : vector<32xf32> to vector<1x32xf32>
    %cst_62 = arith.constant 1.600000e+01 : f32
    %157 = vector.broadcast %cst_62 : f32 to vector<1x32xf32>
    %158 = arith.divf %156, %157 : vector<1x32xf32>
    %159 = vector.broadcast %158 : vector<1x32xf32> to vector<16x32xf32>
    %160 = arith.subf %154, %159 : vector<16x32xf32>
    %161 = arith.mulf %160, %160 : vector<16x32xf32>
    %cst_63 = arith.constant dense<0.000000e+00> : vector<32xf32>
    %162 = vector.multi_reduction <add>, %161, %cst_63 [0] : vector<16x32xf32> to vector<32xf32>
    %163 = vector.shape_cast %162 : vector<32xf32> to vector<1x32xf32>
    %cst_64 = arith.constant 1.600000e+01 : f32
    %164 = vector.broadcast %cst_64 : f32 to vector<1x32xf32>
    %165 = arith.divf %163, %164 : vector<1x32xf32>
    %166 = vector.broadcast %158 : vector<1x32xf32> to vector<16x32xf32>
    %167 = arith.subf %154, %166 : vector<16x32xf32>
    %168 = vector.broadcast %16 : vector<1x32xf32> to vector<16x32xf32>
    %169 = arith.mulf %168, %167 : vector<16x32xf32>
    %cst_65 = arith.constant 9.99999974E-6 : f32
    %170 = vector.broadcast %cst_65 : f32 to vector<1x32xf32>
    %171 = arith.addf %165, %170 : vector<1x32xf32>
    %172 = math.rsqrt %171 : vector<1x32xf32>
    %173 = vector.broadcast %172 : vector<1x32xf32> to vector<16x32xf32>
    %174 = arith.mulf %169, %173 : vector<16x32xf32>
    %175 = vector.broadcast %17 : vector<1x32xf32> to vector<16x32xf32>
    %176 = arith.addf %174, %175 : vector<16x32xf32>
    %cst_66 = arith.constant 0.000000e+00 : f32
    %177 = vector.broadcast %cst_66 : f32 to vector<16x32xf32>
    %178 = arith.maximumf %176, %177 : vector<16x32xf32>
    %179 = vector.extract_strided_slice %153 {offsets = [16, 0], sizes = [16, 32], strides = [1, 1]} : vector<64x32xf32> to vector<16x32xf32>
    %cst_67 = arith.constant dense<0.000000e+00> : vector<32xf32>
    %180 = vector.multi_reduction <add>, %179, %cst_67 [0] : vector<16x32xf32> to vector<32xf32>
    %181 = vector.shape_cast %180 : vector<32xf32> to vector<1x32xf32>
    %cst_68 = arith.constant 1.600000e+01 : f32
    %182 = vector.broadcast %cst_68 : f32 to vector<1x32xf32>
    %183 = arith.divf %181, %182 : vector<1x32xf32>
    %184 = vector.broadcast %183 : vector<1x32xf32> to vector<16x32xf32>
    %185 = arith.subf %179, %184 : vector<16x32xf32>
    %186 = arith.mulf %185, %185 : vector<16x32xf32>
    %cst_69 = arith.constant dense<0.000000e+00> : vector<32xf32>
    %187 = vector.multi_reduction <add>, %186, %cst_69 [0] : vector<16x32xf32> to vector<32xf32>
    %188 = vector.shape_cast %187 : vector<32xf32> to vector<1x32xf32>
    %cst_70 = arith.constant 1.600000e+01 : f32
    %189 = vector.broadcast %cst_70 : f32 to vector<1x32xf32>
    %190 = arith.divf %188, %189 : vector<1x32xf32>
    %191 = vector.broadcast %183 : vector<1x32xf32> to vector<16x32xf32>
    %192 = arith.subf %179, %191 : vector<16x32xf32>
    %193 = vector.broadcast %16 : vector<1x32xf32> to vector<16x32xf32>
    %194 = arith.mulf %193, %192 : vector<16x32xf32>
    %cst_71 = arith.constant 9.99999974E-6 : f32
    %195 = vector.broadcast %cst_71 : f32 to vector<1x32xf32>
    %196 = arith.addf %190, %195 : vector<1x32xf32>
    %197 = math.rsqrt %196 : vector<1x32xf32>
    %198 = vector.broadcast %197 : vector<1x32xf32> to vector<16x32xf32>
    %199 = arith.mulf %194, %198 : vector<16x32xf32>
    %200 = vector.broadcast %17 : vector<1x32xf32> to vector<16x32xf32>
    %201 = arith.addf %199, %200 : vector<16x32xf32>
    %cst_72 = arith.constant 0.000000e+00 : f32
    %202 = vector.broadcast %cst_72 : f32 to vector<16x32xf32>
    %203 = arith.maximumf %201, %202 : vector<16x32xf32>
    %204 = vector.extract_strided_slice %153 {offsets = [32, 0], sizes = [16, 32], strides = [1, 1]} : vector<64x32xf32> to vector<16x32xf32>
    %cst_73 = arith.constant dense<0.000000e+00> : vector<32xf32>
    %205 = vector.multi_reduction <add>, %204, %cst_73 [0] : vector<16x32xf32> to vector<32xf32>
    %206 = vector.shape_cast %205 : vector<32xf32> to vector<1x32xf32>
    %cst_74 = arith.constant 1.600000e+01 : f32
    %207 = vector.broadcast %cst_74 : f32 to vector<1x32xf32>
    %208 = arith.divf %206, %207 : vector<1x32xf32>
    %209 = vector.broadcast %208 : vector<1x32xf32> to vector<16x32xf32>
    %210 = arith.subf %204, %209 : vector<16x32xf32>
    %211 = arith.mulf %210, %210 : vector<16x32xf32>
    %cst_75 = arith.constant dense<0.000000e+00> : vector<32xf32>
    %212 = vector.multi_reduction <add>, %211, %cst_75 [0] : vector<16x32xf32> to vector<32xf32>
    %213 = vector.shape_cast %212 : vector<32xf32> to vector<1x32xf32>
    %cst_76 = arith.constant 1.600000e+01 : f32
    %214 = vector.broadcast %cst_76 : f32 to vector<1x32xf32>
    %215 = arith.divf %213, %214 : vector<1x32xf32>
    %216 = vector.broadcast %208 : vector<1x32xf32> to vector<16x32xf32>
    %217 = arith.subf %204, %216 : vector<16x32xf32>
    %218 = vector.broadcast %16 : vector<1x32xf32> to vector<16x32xf32>
    %219 = arith.mulf %218, %217 : vector<16x32xf32>
    %cst_77 = arith.constant 9.99999974E-6 : f32
    %220 = vector.broadcast %cst_77 : f32 to vector<1x32xf32>
    %221 = arith.addf %215, %220 : vector<1x32xf32>
    %222 = math.rsqrt %221 : vector<1x32xf32>
    %223 = vector.broadcast %222 : vector<1x32xf32> to vector<16x32xf32>
    %224 = arith.mulf %219, %223 : vector<16x32xf32>
    %225 = vector.broadcast %17 : vector<1x32xf32> to vector<16x32xf32>
    %226 = arith.addf %224, %225 : vector<16x32xf32>
    %cst_78 = arith.constant 0.000000e+00 : f32
    %227 = vector.broadcast %cst_78 : f32 to vector<16x32xf32>
    %228 = arith.maximumf %226, %227 : vector<16x32xf32>
    %229 = vector.extract_strided_slice %153 {offsets = [48, 0], sizes = [16, 32], strides = [1, 1]} : vector<64x32xf32> to vector<16x32xf32>
    %cst_79 = arith.constant dense<0.000000e+00> : vector<32xf32>
    %230 = vector.multi_reduction <add>, %229, %cst_79 [0] : vector<16x32xf32> to vector<32xf32>
    %231 = vector.shape_cast %230 : vector<32xf32> to vector<1x32xf32>
    %cst_80 = arith.constant 1.600000e+01 : f32
    %232 = vector.broadcast %cst_80 : f32 to vector<1x32xf32>
    %233 = arith.divf %231, %232 : vector<1x32xf32>
    %234 = vector.broadcast %233 : vector<1x32xf32> to vector<16x32xf32>
    %235 = arith.subf %229, %234 : vector<16x32xf32>
    %236 = arith.mulf %235, %235 : vector<16x32xf32>
    %cst_81 = arith.constant dense<0.000000e+00> : vector<32xf32>
    %237 = vector.multi_reduction <add>, %236, %cst_81 [0] : vector<16x32xf32> to vector<32xf32>
    %238 = vector.shape_cast %237 : vector<32xf32> to vector<1x32xf32>
    %cst_82 = arith.constant 1.600000e+01 : f32
    %239 = vector.broadcast %cst_82 : f32 to vector<1x32xf32>
    %240 = arith.divf %238, %239 : vector<1x32xf32>
    %241 = vector.broadcast %233 : vector<1x32xf32> to vector<16x32xf32>
    %242 = arith.subf %229, %241 : vector<16x32xf32>
    %243 = vector.broadcast %16 : vector<1x32xf32> to vector<16x32xf32>
    %244 = arith.mulf %243, %242 : vector<16x32xf32>
    %cst_83 = arith.constant 9.99999974E-6 : f32
    %245 = vector.broadcast %cst_83 : f32 to vector<1x32xf32>
    %246 = arith.addf %240, %245 : vector<1x32xf32>
    %247 = math.rsqrt %246 : vector<1x32xf32>
    %248 = vector.broadcast %247 : vector<1x32xf32> to vector<16x32xf32>
    %249 = arith.mulf %244, %248 : vector<16x32xf32>
    %250 = vector.broadcast %17 : vector<1x32xf32> to vector<16x32xf32>
    %251 = arith.addf %249, %250 : vector<16x32xf32>
    %cst_84 = arith.constant 0.000000e+00 : f32
    %252 = vector.broadcast %cst_84 : f32 to vector<16x32xf32>
    %253 = arith.maximumf %251, %252 : vector<16x32xf32>
    %254 = tpu.concatenate %178, %203, %228, %253 in 0 : vector<16x32xf32>, vector<16x32xf32>, vector<16x32xf32>, vector<16x32xf32> -> vector<64x32xf32>
    %c0_85 = arith.constant 0 : index
    %c0_86 = arith.constant 0 : index
    %255 = vector.load %arg9[%c0_85, %c0_86] : memref<64x32xf32, #tpu.memory_space<vmem>>, vector<64x32xf32>
    tpu.vector_store %arg9[%c0_85, %c0_86], %254 {strides = array<i32>} : memref<64x32xf32, #tpu.memory_space<vmem>>, vector<64x32xf32>,
    return
  }
  func.func @transform_0(%arg0: i32) -> (i32, i32) {
    %c0_i32 = arith.constant 0 : i32
    %c0_i32_0 = arith.constant 0 : i32
    return %arg0, %c0_i32 : i32, i32
  }
  func.func @transform_1(%arg0: i32) -> (i32, i32) {
    %c0_i32 = arith.constant 0 : i32
    %c0_i32_0 = arith.constant 0 : i32
    %c0_i32_1 = arith.constant 0 : i32
    return %c0_i32, %c0_i32_0 : i32, i32
  }
  func.func @transform_2(%arg0: i32) -> (i32, i32) {
    %c0_i32 = arith.constant 0 : i32
    %c0_i32_0 = arith.constant 0 : i32
    %c0_i32_1 = arith.constant 0 : i32
    return %c0_i32, %c0_i32_0 : i32, i32
  }
  func.func @transform_3(%arg0: i32) -> (i32, i32) {
    %c0_i32 = arith.constant 0 : i32
    %c0_i32_0 = arith.constant 0 : i32
    %c0_i32_1 = arith.constant 0 : i32
    return %c0_i32, %c0_i32_0 : i32, i32
  }
  func.func @transform_4(%arg0: i32) -> (i32, i32) {
    %c0_i32 = arith.constant 0 : i32
    %c0_i32_0 = arith.constant 0 : i32
    %c0_i32_1 = arith.constant 0 : i32
    return %c0_i32, %c0_i32_0 : i32, i32
  }
  func.func @transform_5(%arg0: i32) -> (i32, i32) {
    %c0_i32 = arith.constant 0 : i32
    %c0_i32_0 = arith.constant 0 : i32
    %c0_i32_1 = arith.constant 0 : i32
    return %c0_i32, %c0_i32_0 : i32, i32
  }
  func.func @transform_6(%arg0: i32) -> (i32, i32) {
    %c0_i32 = arith.constant 0 : i32
    %c0_i32_0 = arith.constant 0 : i32
    %c0_i32_1 = arith.constant 0 : i32
    return %c0_i32, %c0_i32_0 : i32, i32
  }
  func.func @transform_7(%arg0: i32) -> (i32, i32) {
    %c0_i32 = arith.constant 0 : i32
    %c0_i32_0 = arith.constant 0 : i32
    %c0_i32_1 = arith.constant 0 : i32
    return %c0_i32, %c0_i32_0 : i32, i32
  }
  func.func @transform_8(%arg0: i32) -> (i32, i32) {
    %c0_i32 = arith.constant 0 : i32
    %c0_i32_0 = arith.constant 0 : i32
    return %arg0, %c0_i32 : i32, i32
  }
  func.func @transform_9(%arg0: i32) -> (i32, i32, i32, i32) {
    %c0_i32 = arith.constant 0 : i32
    %c0_i32_0 = arith.constant 0 : i32
    %c0_i32_1 = arith.constant 0 : i32
    %c0_i32_2 = arith.constant 0 : i32
    return %arg0, %c0_i32, %c0_i32_0, %c0_i32_1 : i32, i32, i32, i32
  }
}

</mosaic_0001>

<bundles_post_ra>
// kernel: gnn_layer_forward.1
= control target key start
LH: loop header
LB: loop body
LE: loop exit
PB: predicated region body
PF: predicated region fallthrough
CT: control target
= control target key end

     0   :  { %s2348_s0 = inlined_call_operand.vmem [shape: bf16[128,32], index: 0, kind: input, shape index: {}]   ;;  %s2349_s1 = inlined_call_operand.vmem [shape: f32[16,16], index: 1, kind: input, shape index: {}]   ;;  %s2350_s2 = inlined_call_operand.vmem [shape: f32[16,32], index: 2, kind: input, shape index: {}]   ;;  %s2351_s3 = inlined_call_operand.vmem [shape: bf16[32,32], index: 3, kind: input, shape index: {}]   ;;  %s2352_s4 = inlined_call_operand.vmem [shape: f32[32,2], index: 4, kind: input, shape index: {}]   ;;  %s2353_s5 = inlined_call_operand.vmem [shape: f32[32,2], index: 5, kind: input, shape index: {}]   ;;  %s2354_s6 = inlined_call_operand.vmem [shape: f32[4,32], index: 6, kind: input, shape index: {}]   ;;  %s2355_s7 = inlined_call_operand.vmem [shape: bf16[32,32], index: 7, kind: input, shape index: {}]   ;;  %s2356_s8 = inlined_call_operand.hbm [shape: f32[128,32], index: 8, kind: output, shape index: {0}]   ;;  %s2357_s9 = inlined_call_operand.hbm [shape: bf16[8,1,16,16], index: 9, kind: output, shape index: {1}]  }
   0x1   :  { %2358 = sst [smem:[#allocation8_spill]] %s2348_s0 }
   0x2   :  { %2359 = sst [smem:[#allocation9_spill]] %s2349_s1 }
   0x3   :  { %15 = vsyncpa [#allocation3], 0 }
   0x4   :  { %17 = vsyncpa [#allocation3 + $0x1], 0 }
   0x5   :  { %18 = vsyncpa [#allocation5], 0 }
   0x6   :  { %20 = vsyncpa [#allocation5 + $0x1], 0  ;;  %s1913_s30 = smov 0   ;;  %s1915_s10 = smov 0  }
   0x7   :  { %s1917_s11 = smov 0   ;;  %s1919_s12 = smov 0  }
   0x8 LB: > { %s1934_s13 = sadd.s32 4294967295, %s1848_s12   ;;  %s1559_s14 = sadd.s32 4294967294, %s1848_s12   ;;  %s1848_s12 = sphi %s1919_s12, %s2371_s12   ;;  %s1844_s11 = sphi %s1917_s11, %s2370_s11   ;;  %s1840_s10 = sphi %s1915_s10, %s2369_s10   ;;  %s1836_s30 = sphi %s1913_s30, %s2368_s30  }
   0x9   : > { %s1938_s15 = sadd.s32 1, %s1848_s12   ;;  %s206_s16 = sadd.s32 1, %s1844_s11 }
   0xa   : > { %s203_s17 = ssub.s32 %s1848_s12, %s1938_s15  ;;  %p216_p0 = scmp.ne.s32.totalorder %s1844_s11, %s1840_s10 }
   0xb   : > { %p204_p1 = scmp.eq.s32.totalorder %s203_s17, 0  ;;  %p217_p2 = scmp.eq.s32.totalorder %s1934_s13, 1 }
   0xc   : > { %p222_p3 = scmp.ne.s32.totalorder %s1840_s10, %s1836_s30  ;;  %p223_p4 = scmp.eq.s32.totalorder %s1559_s14, 1 }
   0xd   : > { %s1949_s18 = scalar_select %p204_p1, %s1844_s11, %s206_s16  }
   0xe   : > { %p1951_p5 = por %p217_p2, %p216_p0  ;;  %p1955_p6 = por %p223_p4, %p222_p3 }
   0xf   : > { %p1562_p7 = scmp.ge.s32.totalorder %s1848_s12, 1  ;;  %p297_p8 = scmp.lt.s32.totalorder %s1848_s12, 3 }
  0x11   : > { %p298_p9 = pnand %p1562_p7, %p297_p8 }
  0x12   : > { %s1565_s23 = sshll.u32 (!%p298_p9), %s1934_s13, 3  ;;  %s2362_s0 = sld [smem:[#allocation8_spill]] (!%p298_p9) }
  0x13   : > { %301 = sbr.rel (%p298_p9) target bundleno = 1713 (0x6b1), region = 52  ;;  %p339_p10 = scmp.lt.s32.totalorder (!%p298_p9), %s1565_s23, 15 }
  0x14   : > { %s2363_s1 = sld [smem:[#allocation9_spill]] (!%p298_p9)  ;;  %s1852_s14 = smov (!%p298_p9), 16  }
  0x15   : > { %s1853_s21 = smov (!%p298_p9), 32   ;;  %s1854_s22 = smov (!%p298_p9), 48  }
  0x16   : > { %s1856_s24 = smov (!%p298_p9), 112   ;;  %s1857_s25 = smov (!%p298_p9), 80  }
  0x18   : > { %v1641_v0 = vld [vmem:[%s2351_s3 + $0x8] sm:$0xff]  ;;  %v1640_v1 = vld [vmem:[%s2351_s3] sm:$0xff]  ;;  %s2373_s23 = smov (!%p339_p10, %s1565_s23), 15  ;;  %vm395_vm0 = vcmask 261120   ;;  %v517_v4 = vld [vmem:[%s2353_s5 + $0x18] sm:$0xff]  ;;  %v1851_v46 = vmov 0  }
  0x19   : > { %414 = vmatpush.bf16.msra.mxu0 %v1641_v0  ;;  %s1566_s26 = sshll.u32 %s2373_s23, 2  ;;  %v516_v5 = vld [vmem:[%s2353_s5 + $0x10] sm:$0xff]  ;;  %536 = vmatpush.msra.mxu3 %v517_v4  ;;  %v515_v6 = vld [vmem:[%s2353_s5 + $0x8] sm:$0xff]  ;;  %v448_v7 = vld [vmem:[%s2352_s4 + $0x18] sm:$0xff]  ;;  %vm932_vm3 = vcmask 392448   ;;  %vm799_vm4 = vcmask 261248  }
  0x1a   : > { %s342_s29 = scalar_lea.vmem %s2362_s0, %s1566_s26  ;;  %v447_v8 = vld [vmem:[%s2352_s4 + $0x10] sm:$0xff]  ;;  %485 = vmatpush.msra.mxu1 %v448_v7  ;;  %v514_v9 = vld [vmem:[%s2353_s5] sm:$0xff]  ;;  %v446_v10 = vld [vmem:[%s2352_s4 + $0x8] sm:$0xff]  ;;  %1706 = vset.pattern.permute.xlu2 %v1851_v46  ;;  %vm1065_vm7 = vcmask 523648   ;;  %s1855_s23 = smov 96   ;;  %vm679_vm11 = vcmask 130048  }
  0x1b   : > { %v1636_v2 = vld [vmem:[%s342_s29] sm:$0xff]  ;;  %v1637_v3 = vld [vmem:[%s342_s29 + $0x8] sm:$0xff]  ;;  %537 = vmatpush.msra.mxu3 %v516_v5  ;;  %v1638_v12 = vld [vmem:[%s342_s29 + $0x10] sm:$0xff]  ;;  %1705 = vset.pattern.permute.xlu0 %v1851_v46  ;;  %s2151_s26 = sand.u32 1, %s1840_s10  }
  0x1c   : > { %v357_v11 = vld [vmem:[%s2350_s2] sm:$0xff]  ;;  %486 = vmatpush.msra.mxu1 %v447_v8  ;;  %v358_v13 = vld [vmem:[%s2350_s2 + $0x8] sm:$0xff]  ;;  %v1639_v14 = vld [vmem:[%s342_s29 + $0x18] sm:$0xff]  ;;  %s1850_s29 = smov 127   ;;  %s1563_s16 = sshll.u32 %s2151_s26, 6 }
  0x1d   : > { %415 = vmatpush.bf16.msra.mxu0 %v1640_v1  ;;  %538 = vmatpush.msra.mxu3 %v515_v6  ;;  %v445_v15 = vld [vmem:[%s2352_s4] sm:$0xff]  ;;  %v2047_v56 = vld [vmem:[%s2363_s1 + $0x8] sm:$0xff]  ;;  %s2250_s17 = scalar_lea.vmem [#allocation2], %s1563_s16  ;;  %s1431_s28 = scalar_lea.sflag [#allocation5], %s2151_s26 }
  0x1e   : > { %487 = vmatpush.msra.mxu1 %v446_v10  ;;  %v2038_v53 = vld [vmem:[%s2363_s1] sm:$0xff] }
  0x1f   : > { %539 = vmatpush.msra.mxu3 %v514_v9 }
  0x20   : > { %1591 = vmatmul.msk.bf16.vlgmr.msra.gmra.mxu0 %vm395_vm0, %v1636_v2  ;;  %1603 = vmatmul.msk.f32.vlgmr.msra.gmra.mxu3 %vm395_vm0, %v357_v11 }
  0x21   : > { %488 = vmatpush.msra.mxu1 %v445_v15 }
  0x28   : > { %1604 = vmatmul.msk.f32.gmra.mxu3 %vm395_vm0, %v358_v13 }
  0x30   : > { %1592 = vmatmul.msk.bf16.gmra.mxu0 %vm395_vm0, %v1637_v3 }
  0x40   : > { %1593 = vmatmul.msk.bf16.gmra.mxu0 %vm395_vm0, %v1638_v12 }
  0x50   : > { %1594 = vmatmul.msk.bf16.gmra.mxu0 %vm395_vm0, %v1639_v14 }
  0x9d   : > { %v417_v16 = vpop.f32.mrf.mxu0 }
  0x9e   : > { %1595 = vmatmul.msk.f32.vlgmr.msra.gmra.mxu1 %vm395_vm0, %v417_v16  ;;  %v437_v17 = vpack.c.bf16 %v417_v16, %v417_v16 }
  0xa0   : > { %v742_v20 = vunpack.c.l.b16 %v437_v17 }
  0xa3   : > { %v2011_v30 = vpop.f32.mrf.mxu3 }
  0xa4   : > { %613 = vrot.lane.b32.xlu0 %v2011_v30, %s1850_s29 }
  0xa5   : > { %v419_v18 = vpop.f32.mrf.mxu0 }
  0xa6   : > { %v438_v19 = vpack.c.bf16 %v419_v18, %v419_v18  ;;  %1596 = vmatmul.msk.f32.gmra.mxu1 %vm395_vm0, %v419_v18 }
  0xa8   : > { %v743_v21 = vunpack.c.l.b16 %v438_v19 }
  0xaa   : > { %v744_v22 = vpack.c.b16 %v743_v21, %v742_v20 }
  0xab   : > { %v2016_v32 = vpop.f32.mrf.mxu3 }
  0xac   : > { %756 = vmatpush.bf16.msrb.mxu3 %v744_v22  ;;  %615 = vrot.lane.b32.xlu0 %v2016_v32, %s1850_s29 }
  0xad   : > { %v422_v23 = vpop.f32.mrf.mxu0 }
  0xae   : > { %1597 = vmatmul.msk.f32.gmra.mxu1 %vm395_vm0, %v422_v23  ;;  %v439_v24 = vpack.c.bf16 %v422_v23, %v422_v23 }
  0xb0   : > { %v878_v27 = vunpack.c.l.b16 %v439_v24 }
  0xb5   : > { %v424_v25 = vpop.f32.mrf.mxu0 }
  0xb6   : > { %v440_v26 = vpack.c.bf16 %v424_v25, %v424_v25  ;;  %1598 = vmatmul.msk.f32.gmra.mxu1 %vm395_vm0, %v424_v25 }
  0xb8   : > { %v879_v28 = vunpack.c.l.b16 %v440_v26 }
  0xba   : > { %v880_v29 = vpack.c.b16 %v879_v28, %v878_v27 }
  0xbc   : > { %892 = vmatpush.bf16.msra.mxu3 %v880_v29 }
  0xbd   : > { %v427_v31 = vpop.f32.mrf.mxu0 }
  0xbe   : > { %1599 = vmatmul.msk.f32.gmra.mxu1 %vm395_vm0, %v427_v31  ;;  %v441_v33 = vpack.c.bf16 %v427_v31, %v427_v31 }
  0xc0   : > { %v1011_v36 = vunpack.c.l.b16 %v441_v33 }
  0xc5   : > { %v429_v34 = vpop.f32.mrf.mxu0 }
  0xc6   : > { %v442_v35 = vpack.c.bf16 %v429_v34, %v429_v34  ;;  %1600 = vmatmul.msk.f32.gmra.mxu1 %vm395_vm0, %v429_v34 }
  0xc8   : > { %v1012_v37 = vunpack.c.l.b16 %v442_v35 }
  0xca   : > { %v1013_v38 = vpack.c.b16 %v1012_v37, %v1011_v36 }
  0xcc   : > { %1025 = vmatpush.bf16.msra.mxu2 %v1013_v38 }
  0xcd   : > { %v432_v39 = vpop.f32.mrf.mxu0 }
  0xce   : > { %1601 = vmatmul.msk.f32.gmra.mxu1 %vm395_vm0, %v432_v39  ;;  %v443_v40 = vpack.c.bf16 %v432_v39, %v432_v39 }
  0xd0   : > { %v2022_v42 = vunpack.c.l.b16 %v443_v40 }
  0xd5   : > { %v434_v41 = vpop.f32.mrf.mxu0 }
  0xd6   : > { %v444_v43 = vpack.c.bf16 %v434_v41, %v434_v41  ;;  %1602 = vmatmul.msk.f32.gmra.mxu1 %vm395_vm0, %v434_v41 }
  0xd8   : > { %v2025_v44 = vunpack.c.l.b16 %v444_v43 }
  0xda   : > { %v1146_v45 = vpack.c.b16 %v2025_v44, %v2022_v42 }
 0x116   : > { %v614_v62 = vpop.permute.xlu0 %613 }
 0x11b   : > { %v490_v47 = vpop.f32.mrf.mxu1 }
 0x11c   : > { %555 = vrot.lane.b32.xlu1 %v490_v47, %s1850_s29  ;;  %v655_v59 = vadd.f32 %v2011_v30, %v490_v47 }
 0x11e   : > { %v616_v63 = vpop.permute.xlu0 %615 }
 0x123   : > { %v493_v48 = vpop.f32.mrf.mxu1 }
 0x124   : > { %557 = vrot.lane.b32.xlu1 %v493_v48, %s1850_s29  ;;  %v656_v9 = vadd.f32 %v2016_v32, %v493_v48 }
 0x12b   : > { %v496_v49 = vpop.f32.mrf.mxu1 }
 0x12c   : > { %559 = vrot.lane.b32.xlu2 %v496_v49, %s1850_s29  ;;  %v763_v54 = vadd.f32 %v2011_v30, %v496_v49 }
 0x133   : > { %v499_v50 = vpop.f32.mrf.mxu1 }
 0x134   : > { %561 = vrot.lane.b32.xlu2 %v499_v50, %s1850_s29  ;;  %v764_v51 = vadd.f32 %v2016_v32, %v499_v50 }
 0x13b   : > { %v502_v52 = vpop.f32.mrf.mxu1 }
 0x13c   : > { %777 = vperm.xlu2 %1706, %v764_v51   ;;  %563 = vrot.lane.b32.xlu0 %v502_v52, %s1850_s29  ;;  %v899_v57 = vadd.f32 %v2011_v30, %v502_v52 }
 0x143   : > { %v505_v55 = vpop.f32.mrf.mxu1 }
 0x144   : > { %791 = vrot.lane.b32.xlu2 %v2038_v53, %s1852_s14  ;;  %772 = vperm.xlu0 %1705, %v763_v54   ;;  %v900_v60 = vadd.f32 %v2016_v32, %v505_v55 }
 0x145   : > { %565 = vrot.lane.b32.xlu1 %v505_v55, %s1850_s29 }
 0x14b   : > { %v508_v58 = vpop.f32.mrf.mxu1 }
 0x14c   : > { %924 = vrot.lane.b32.xlu2 %v2038_v53, %s1853_s21  ;;  %793 = vrot.lane.b32.xlu0 %v2047_v56, %s1852_s14  ;;  %v1032_v6 = vadd.f32 %v2011_v30, %v508_v58 }
 0x153   : > { %v511_v61 = vpop.f32.mrf.mxu1 }
 0x154   : > { %926 = vrot.lane.b32.xlu2 %v2047_v56, %s1853_s21  ;;  %907 = vperm.xlu0 %1705, %v899_v57   ;;  %v1033_v11 = vadd.f32 %v2016_v32, %v511_v61 }
 0x15c   : > { %660 = vperm.xlu0 %1705, %v655_v59   ;;  %912 = vperm.xlu2 %1706, %v900_v60  }
 0x164   : > { %569 = vrot.lane.b32.xlu0 %v511_v61, %s1850_s29 }
 0x17a   : > { %619 = vxpose.xlu1.b32.start [1/2] (short) (narrow) %v614_v62, 8 }
 0x182   : > { %620 = vxpose.xlu1.b32.end [2/2] (short) (narrow) %v616_v63, 8 }
 0x186   : > { %v560_v2 = vpop.permute.xlu2 %559 }
 0x18e   : > { %v556_v0 = vpop.permute.xlu1 %555  ;;  %v562_v3 = vpop.permute.xlu2 %561 }
 0x18f   : > { %579 = vxpose.xlu0.b32.start [1/8] (short) (narrow) %v556_v0, 8 }
 0x196   : > { %v558_v1 = vpop.permute.xlu1 %557  ;;  %v778_v8 = vpop.permute.xlu2 %777 }
 0x197   : > { %580 = vxpose.xlu0.b32.cont [2/8] (short) (narrow) %v558_v1, 8 }
 0x19e   : > { %v792_v10 = vpop.permute.xlu2 %791 }
 0x19f   : > { %581 = vxpose.xlu0.b32.cont [3/8] (short) (narrow) %v560_v2, 8 }
 0x1a6   : > { %v925_v12 = vpop.permute.xlu2 %924 }
 0x1a7   : > { %582 = vxpose.xlu0.b32.cont [4/8] (short) (narrow) %v562_v3, 8 }
 0x1ae   : > { %v564_v4 = vpop.permute.xlu0 %563  ;;  %v2072_v13 = vpop.permute.xlu2 %926 }
 0x1af   : > { %583 = vxpose.xlu0.b32.cont [5/8] (short) (narrow) %v564_v4, 8 }
 0x1b6   : > { %v913_v14 = vpop.permute.xlu2 %912  ;;  %v773_v15 = vpop.permute.xlu0 %772 }
 0x1b7   : > { %v566_v5 = vpop.permute.xlu1 %565 }
 0x1b8   : > { %584 = vxpose.xlu0.b32.cont [6/8] (short) (narrow) %v566_v5, 8 }
 0x1be   : > { %v794_v17 = vpop.permute.xlu0 %793 }
 0x1c6   : > { %v908_v19 = vpop.permute.xlu0 %907 }
 0x1ce   : > { %v2074_v21 = vpop.permute.xlu0 %660 }
 0x1d5   : > { %1707 = vset.pattern.permute.xlu1 %v1851_v46 }
 0x1d6   : > { %v570_v23 = vpop.permute.xlu0 %569 }
 0x1dc   : > { %1040 = vperm.xlu1 %1707, %v1032_v6  }
 0x21e   : > { %v2060_v7 = vpop.trf.xlu1 }
 0x21f   : > { %766 = vrot.lane.b32.xlu2 %v2060_v7, %s1852_s14 }
 0x227   : > { %901 = vrot.lane.b32.xlu2 %v2060_v7, %s1853_s21  ;;  %s1646_s21 = sshll.u32 %s1934_s13, 5 }
 0x22f   : > { %1034 = vrot.lane.b32.xlu2 %v2060_v7, %s1854_s22 }
 0x237   : > { %567 = vrot.lane.b32.xlu2 %v508_v58, %s1850_s29  ;;  %s1564_s29 = sshll.u32 %s2151_s26, 5 }
 0x238   : > { %s2155_s27 = scalar_lea.vmem [#allocation4], %s1564_s29 }
 0x23f   : > { %1057 = vrot.lane.b32.xlu2 %v2038_v53, %s1854_s22 }
 0x247   : > { %1059 = vrot.lane.b32.xlu2 %v2047_v56, %s1854_s22  ;;  %s1461_s22 = sshll.u32 %s2155_s27, 4  ;;  %s1462_s22 = int_to_ptr.vmem [resolvable:$true] %s1461_s22 }
 0x24e   : > { %v1041_v34 = vpop.permute.xlu1 %1040 }
 0x24f   : > { %665 = vperm.xlu2 %1706, %v656_v9  }
 0x257   : > { %1045 = vperm.xlu2 %1706, %v1033_v11  }
 0x279   : > { %v767_v16 = vpop.permute.xlu2 %766 }
 0x281   : > { %v902_v18 = vpop.permute.xlu2 %901 }
 0x289   : > { %v1035_v20 = vpop.permute.xlu2 %1034 }
 0x291   : > { %v568_v22 = vpop.permute.xlu2 %567 }
 0x292   : > { %585 = vxpose.xlu0.b32.cont [7/8] (short) (narrow) %v568_v22, 8 }
 0x299   : > { %v1058_v24 = vpop.permute.xlu2 %1057 }
 0x29a   : > { %586 = vxpose.xlu0.b32.end [8/8] (short) (narrow) %v570_v23, 8 }
 0x2a1   : > { %v1060_v25 = vpop.permute.xlu2 %1059 }
 0x2a9   : > { %v2081_v30 = vpop.permute.xlu2 %665 }
 0x2b1   : > { %v1046_v50 = vpop.permute.xlu2 %1045 }
 0x306   : > { %v2076_v26 = vpop.trf.xlu0 }
 0x307   : > { %v769_v27 = vadd.f32 %v767_v16, %v2076_v26  ;;  %v904_v28 = vadd.f32 %v902_v18, %v2076_v26  ;;  %v1037_v29 = vadd.f32 %v1035_v20, %v2076_v26 }
 0x309   : > { %v780_v31 = vperm.slane %v769_v27, 0  ;;  %v915_v32 = vperm.slane %v904_v28, 0  ;;  %v1048_v33 = vperm.slane %v1037_v29, 0 }
 0x30b   : > { %v916_v35 = vadd.f32 %v915_v32, %v908_v19  ;;  %v781_v36 = vadd.f32 %v780_v31, %v773_v15  ;;  %v1049_v37 = vadd.f32 %v1048_v33, %v1041_v34  ;;  %v782_v38 = vadd.f32 %v780_v31, %v778_v8 }
 0x30c   : > { %v917_v54 = vadd.f32 %v915_v32, %v913_v14  ;;  %v1050_v58 = vadd.f32 %v1048_v33, %v1046_v50  ;;  %v657_v31 = vadd.f32 %v2060_v7, %v2076_v26 }
 0x30d   : > { %vm918_vm1 = vcmp.gt.f32.partialorder %v916_v35, 0.0  ;;  %v920_v39 = vmul.f32 0.2, %v916_v35  ;;  %vm783_vm2 = vcmp.gt.f32.partialorder %v781_v36, 0.0  ;;  %v785_v40 = vmul.f32 0.2, %v781_v36 }
 0x30e   : > { %v1053_v46 = vmul.f32 0.2, %v1049_v37  ;;  %v786_v47 = vmul.f32 0.2, %v782_v38  ;;  %vm1051_vm5 = vcmp.gt.f32.partialorder %v1049_v37, 0.0  ;;  %vm784_vm6 = vcmp.gt.f32.partialorder %v782_v38, 0.0 }
 0x30f   : > { %v922_v41 = vsel %vm918_vm1, %v916_v35, %v920_v39  ;;  %v787_v43 = vsel %vm783_vm2, %v781_v36, %v785_v40  ;;  %v921_v61 = vmul.f32 0.2, %v917_v54  ;;  %v1054_v62 = vmul.f32 0.2, %v1050_v58 }
 0x310   : > { %v930_v48 = vadd.f32 %v925_v12, %v922_v41  ;;  %v797_v49 = vadd.f32 %v792_v10, %v787_v43  ;;  %v1055_v55 = vsel %vm1051_vm5, %v1049_v37, %v1053_v46  ;;  %v788_v57 = vsel %vm784_vm6, %v782_v38, %v786_v47 }
 0x311   : > { %v1063_v59 = vadd.f32 %v1058_v24, %v1055_v55  ;;  %v798_v60 = vadd.f32 %v794_v17, %v788_v57  ;;  %vm919_vm8 = vcmp.gt.f32.partialorder %v917_v54, 0.0  ;;  %vm1052_vm9 = vcmp.gt.f32.partialorder %v1050_v58, 0.0 }
 0x312   : > { %v933_v51 = vsel %vm932_vm3, %v930_v48, -inf  ;;  %v800_v52 = vsel %vm799_vm4, %v797_v49, -inf  ;;  %v923_v1 = vsel %vm919_vm8, %v917_v54, %v921_v61  ;;  %v1056_v2 = vsel %vm1052_vm9, %v1050_v58, %v1054_v62 }
 0x313   : > { %934 = vmax.xlane.f32.xlu1 %v933_v51  ;;  %801 = vmax.xlane.f32.xlu2 %v800_v52  ;;  %v1066_v63 = vsel %vm1065_vm7, %v1063_v59, -inf  ;;  %v803_v0 = vsel %vm799_vm4, %v798_v60, -inf  ;;  %v931_v3 = vadd.f32 %v2072_v13, %v923_v1  ;;  %v1064_v4 = vadd.f32 %v1060_v25, %v1056_v2 }
 0x314   : > { %v668_v33 = vperm.slane %v657_v31, 0 }
 0x315   : > { %v936_v5 = vsel %vm932_vm3, %v931_v3, -inf  ;;  %v1069_v6 = vsel %vm1065_vm7, %v1064_v4, -inf }
 0x316   : > { %v669_v36 = vadd.f32 %v668_v33, %v2074_v21  ;;  %v670_v26 = vadd.f32 %v668_v33, %v2081_v30 }
 0x318   : > { %v673_v37 = vmul.f32 0.2, %v669_v36  ;;  %vm671_vm10 = vcmp.gt.f32.partialorder %v669_v36, 0.0  ;;  %v674_v40 = vmul.f32 0.2, %v670_v26  ;;  %vm672_vm12 = vcmp.gt.f32.partialorder %v670_v26, 0.0 }
 0x31a   : > { %v675_v7 = vsel %vm671_vm10, %v669_v36, %v673_v37  ;;  %v676_v43 = vsel %vm672_vm12, %v670_v26, %v674_v40 }
 0x31b   : > { %1067 = vmax.xlane.f32.xlu1 %v1066_v63  ;;  %804 = vmax.xlane.f32.xlu2 %v803_v0  ;;  %v677_v39 = vadd.f32 %v675_v7, %v2038_v53  ;;  %v678_v21 = vadd.f32 %v676_v43, %v2047_v56 }
 0x31d   : > { %v680_v41 = vsel %vm679_vm11, %v677_v39, -inf  ;;  %v683_v46 = vsel %vm679_vm11, %v678_v21, -inf }
 0x323   : > { %937 = vmax.xlane.f32.xlu2 %v936_v5  ;;  %1070 = vmax.xlane.f32.xlu1 %v1069_v6 }
 0x386   : > { %v935_v8 = vpop.xlane.xlu1 %934  ;;  %v802_v9 = vpop.xlane.xlu2 %801 }
 0x387   : > { %v939_v10 = vsub.f32 %v930_v48, %v935_v8  ;;  %v806_v11 = vsub.f32 %v797_v49, %v802_v9 }
 0x389   : > { %v941_v12 = vmul.f32 1.442695, %v939_v10  ;;  %v808_v14 = vmul.f32 1.442695, %v806_v11 }
 0x38b   : > { %1712 = vpow2.f32 %v941_v12 }
 0x38c   : > { %1714 = vpow2.f32 %v808_v14 }
 0x38e   : > { %v805_v15 = vpop.xlane.xlu2 %804  ;;  %v1068_v20 = vpop.xlane.xlu1 %1067 }
 0x38f   : > { %v807_v16 = vsub.f32 %v798_v60, %v805_v15  ;;  %v1072_v25 = vsub.f32 %v1063_v59, %v1068_v20 }
 0x391   : > { %v2088_v17 = vpop.eup %1712  ;;  %v810_v18 = vmul.f32 1.442695, %v807_v16  ;;  %v1074_v27 = vmul.f32 1.442695, %v1072_v25 }
 0x392   : > { %v2090_v13 = vpop.eup %1714  ;;  %947 = vrot.lane.b32.xlu0 %v2088_v17, %s1855_s23 }
 0x393   : > { %814 = vrot.lane.b32.xlu2 %v2090_v13, %s1856_s24  ;;  %1716 = vpow2.f32 %v810_v18 }
 0x396   : > { %v938_v19 = vpop.xlane.xlu2 %937  ;;  %v1071_v28 = vpop.xlane.xlu1 %1070 }
 0x397   : > { %v940_v22 = vsub.f32 %v931_v3, %v938_v19  ;;  %v1073_v32 = vsub.f32 %v1064_v4, %v1071_v28 }
 0x399   : > { %v943_v23 = vmul.f32 1.442695, %v940_v22  ;;  %v2096_v24 = vpop.eup %1716  ;;  %v1076_v34 = vmul.f32 1.442695, %v1073_v32 }
 0x39a   : > { %816 = vrot.lane.b32.xlu1 %v2096_v24, %s1856_s24 }
 0x39b   : > { %1718 = vpow2.f32 %v943_v23 }
 0x39c   : > { %1720 = vpow2.f32 %v1074_v27 }
 0x39d   : > { %1722 = vpow2.f32 %v1076_v34 }
 0x3a1   : > { %v2100_v29 = vpop.eup %1718 }
 0x3a2   : > { %949 = vrot.lane.b32.xlu0 %v2100_v29, %s1855_s23  ;;  %v2106_v35 = vpop.eup %1720 }
 0x3a3   : > { %v2111_v38 = vpop.eup %1722 }
 0x3aa   : > { %1080 = vrot.lane.b32.xlu0 %v2106_v35, %s1857_s25 }
 0x3b2   : > { %1082 = vrot.lane.b32.xlu0 %v2111_v38, %s1857_s25 }
 0x3bc   : > { %681 = vmax.xlane.f32.xlu2 %v680_v41 }
 0x3c4   : > { %684 = vmax.xlane.f32.xlu1 %v683_v46 }
 0x3ed   : > { %v815_v47 = vpop.permute.xlu2 %814 }
 0x3ee   : > { %v820_v48 = vsel %vm679_vm11, %v815_v47, 0.0 }
 0x3ef   : > { %821 = vadd.xlane.f32.xlu2 %v820_v48 }
 0x404   : > { %v948_v49 = vpop.permute.xlu0 %947 }
 0x405   : > { %v953_v30 = vsel %vm679_vm11, %v948_v49, 0.0 }
 0x406   : > { %954 = vadd.xlane.f32.xlu2 %v953_v30 }
 0x40c   : > { %v817_v53 = vpop.permute.xlu1 %816 }
 0x40d   : > { %v823_v50 = vsel %vm679_vm11, %v817_v53, 0.0 }
 0x40e   : > { %824 = vadd.xlane.f32.xlu0 %v823_v50 }
 0x414   : > { %v950_v51 = vpop.permute.xlu0 %949 }
 0x415   : > { %v956_v52 = vsel %vm679_vm11, %v950_v51, 0.0 }
 0x416   : > { %957 = vadd.xlane.f32.xlu1 %v956_v52 }
 0x41c   : > { %v1081_v62 = vpop.permute.xlu0 %1080 }
 0x41d   : > { %v1086_v0 = vsel %vm679_vm11, %v1081_v62, 0.0 }
 0x424   : > { %v1083_v2 = vpop.permute.xlu0 %1082 }
 0x425   : > { %v1089_v3 = vsel %vm679_vm11, %v1083_v2, 0.0 }
 0x42f   : > { %v682_v56 = vpop.xlane.xlu2 %681 }
 0x430   : > { %v686_v54 = vsub.f32 %v677_v39, %v682_v56 }
 0x432   : > { %v688_v55 = vmul.f32 1.442695, %v686_v54 }
 0x434   : > { %1724 = vpow2.f32 %v688_v55 }
 0x437   : > { %v685_v57 = vpop.xlane.xlu1 %684 }
 0x438   : > { %v687_v58 = vsub.f32 %v678_v21, %v685_v57 }
 0x43a   : > { %v2124_v59 = vpop.eup %1724  ;;  %v690_v60 = vmul.f32 1.442695, %v687_v58 }
 0x43b   : > { %v692_v61 = vsel %vm679_vm11, %v2124_v59, 0.0 }
 0x43c   : > { %693 = vadd.xlane.f32.xlu2 %v692_v61  ;;  %1726 = vpow2.f32 %v690_v60 }
 0x442   : > { %v2128_v63 = vpop.eup %1726 }
 0x443   : > { %v695_v1 = vsel %vm679_vm11, %v2128_v63, 0.0 }
 0x444   : > { %1087 = vadd.xlane.f32.xlu2 %v1086_v0  ;;  %696 = vadd.xlane.f32.xlu1 %v695_v1 }
 0x44c   : > { %1090 = vadd.xlane.f32.xlu1 %v1089_v3 }
 0x462   : > { %v822_v4 = vpop.xlane.xlu2 %821 }
 0x463   : > { %v826_v5 = vmax.f32 %v822_v4, 1e-30 }
 0x465   : > { %1728 = vrcp.f32 %v826_v5  ;;  %v839_v20 = vand.u32 2147483648, %v826_v5  ;;  %vm833_vm14 = vweird.f32 %v826_v5  ;;  %v837_v23 = vand.u32 2147483647, %v826_v5 }
 0x467   : > { %v840_v32 = vor.u32 1.1754944e-38, %v839_v20  ;;  %vm838_vm1 = vcmp.eq.f32.partialorder %v837_v23, 8.507059e+37 }
 0x46b   : > { %v1729_v6 = vpop.eup %1728 }
 0x46c   : > { %v829_v10 = vmul.f32 %v1729_v6, %v826_v5  ;;  %vm834_vm13 = vweird.f32 %v1729_v6 }
 0x46d   : > { %vm835_vm15 = vmor %vm833_vm14, %vm834_vm13 }
 0x46e   : > { %v830_v11 = vsub.f32 1.0, %v829_v10 }
 0x470   : > { %v831_v15 = vmul.f32 %v1729_v6, %v830_v11 }
 0x472   : > { %v832_v19 = vadd.f32 %v1729_v6, %v831_v15 }
 0x474   : > { %v836_v31 = vsel %vm835_vm15, %v1729_v6, %v832_v19 }
 0x475   : > { %v841_v37 = vsel %vm838_vm1, %v840_v32, %v836_v31 }
 0x476   : > { %v842_v43 = vmul.f32 %v2090_v13, %v841_v37 }
 0x478   : > { %v858_v56 = vpack.c.bf16 %v842_v43, %v842_v43 }
 0x479   : > { %v955_v8 = vpop.xlane.xlu2 %954 }
 0x47a   : > { %v959_v9 = vmax.f32 %v955_v8, 1e-30  ;;  %v871_v62 = vunpack.c.l.b16 %v858_v56 }
 0x47c   : > { %1730 = vrcp.f32 %v959_v9  ;;  %vm966_vm4 = vweird.f32 %v959_v9  ;;  %v972_v41 = vand.u32 2147483648, %v959_v9  ;;  %v970_v47 = vand.u32 2147483647, %v959_v9 }
 0x47e   : > { %v973_v51 = vor.u32 1.1754944e-38, %v972_v41  ;;  %vm971_vm9 = vcmp.eq.f32.partialorder %v970_v47, 8.507059e+37 }
 0x481   : > { %v825_v14 = vpop.xlane.xlu0 %824 }
 0x482   : > { %v1731_v12 = vpop.eup %1730  ;;  %v827_v16 = vmax.f32 %v825_v14, 1e-30 }
 0x483   : > { %v962_v18 = vmul.f32 %v1731_v12, %v959_v9  ;;  %vm967_vm2 = vweird.f32 %v1731_v12 }
 0x484   : > { %1732 = vrcp.f32 %v827_v16  ;;  %v854_v7 = vand.u32 2147483648, %v827_v16  ;;  %v852_v39 = vand.u32 2147483647, %v827_v16  ;;  %vm848_vm5 = vweird.f32 %v827_v16  ;;  %vm2135_vm6 = vmor %vm966_vm4, %vm967_vm2 }
 0x485   : > { %v963_v22 = vsub.f32 1.0, %v962_v18  ;;  %vm732_vm4 = vcmask 125952  }
 0x486   : > { %v855_v49 = vor.u32 1.1754944e-38, %v854_v7  ;;  %vm853_vm8 = vcmp.eq.f32.partialorder %v852_v39, 8.507059e+37 }
 0x487   : > { %v964_v33 = vmul.f32 %v1731_v12, %v963_v22 }
 0x489   : > { %v958_v25 = vpop.xlane.xlu1 %957  ;;  %v965_v40 = vadd.f32 %v1731_v12, %v964_v33 }
 0x48a   : > { %v1733_v27 = vpop.eup %1732  ;;  %v960_v28 = vmax.f32 %v958_v25, 1e-30 }
 0x48b   : > { %v844_v34 = vmul.f32 %v1733_v27, %v827_v16  ;;  %vm849_vm3 = vweird.f32 %v1733_v27  ;;  %v969_v50 = vsel %vm2135_vm6, %v1731_v12, %v965_v40 }
 0x48c   : > { %1734 = vrcp.f32 %v960_v28  ;;  %vm850_vm7 = vmor %vm848_vm5, %vm849_vm3  ;;  %v987_v55 = vand.u32 2147483648, %v960_v28  ;;  %v974_v57 = vsel %vm971_vm9, %v973_v51, %v969_v50  ;;  %v985_v61 = vand.u32 2147483647, %v960_v28 }
 0x48d   : > { %v845_v36 = vsub.f32 1.0, %v844_v34  ;;  %vm981_vm12 = vweird.f32 %v960_v28  ;;  %v975_v1 = vmul.f32 %v2088_v17, %v974_v57 }
 0x48e   : > { %v988_v3 = vor.u32 1.1754944e-38, %v987_v55  ;;  %vm986_vm14 = vcmp.eq.f32.partialorder %v985_v61, 8.507059e+37 }
 0x48f   : > { %v846_v26 = vmul.f32 %v1733_v27, %v845_v36  ;;  %v991_v8 = vpack.c.bf16 %v975_v1, %v975_v1 }
 0x491   : > { %v847_v21 = vadd.f32 %v1733_v27, %v846_v26  ;;  %v1004_v10 = vunpack.c.l.b16 %v991_v8 }
 0x492   : > { %v1735_v48 = vpop.eup %1734 }
 0x493   : > { %v977_v30 = vmul.f32 %v1735_v48, %v960_v28  ;;  %v851_v53 = vsel %vm850_vm7, %v1733_v27, %v847_v21  ;;  %vm982_vm10 = vweird.f32 %v1735_v48 }
 0x494   : > { %v856_v52 = vsel %vm853_vm8, %v855_v49, %v851_v53  ;;  %vm983_vm13 = vmor %vm981_vm12, %vm982_vm10 }
 0x495   : > { %v978_v13 = vsub.f32 1.0, %v977_v30  ;;  %v857_v54 = vmul.f32 %v2096_v24, %v856_v52 }
 0x497   : > { %v979_v58 = vmul.f32 %v1735_v48, %v978_v13  ;;  %v859_v60 = vpack.c.bf16 %v857_v54, %v857_v54 }
 0x499   : > { %v872_v0 = vunpack.c.l.b16 %v859_v60  ;;  %v980_v2 = vadd.f32 %v1735_v48, %v979_v58 }
 0x49b   : > { %v873_v4 = vpack.c.b16 %v872_v0, %v871_v62  ;;  %v984_v5 = vsel %vm983_vm13, %v1735_v48, %v980_v2 }
 0x49c   : > { %v989_v6 = vsel %vm986_vm14, %v988_v3, %v984_v5 }
 0x49d   : > { %874 = vrot.lane.b32.xlu2 %v873_v4, %s1856_s24  ;;  %v990_v24 = vmul.f32 %v2100_v29, %v989_v6 }
 0x49f   : > { %v992_v9 = vpack.c.bf16 %v990_v24, %v990_v24 }
 0x4a1   : > { %v1005_v11 = vunpack.c.l.b16 %v992_v9 }
 0x4a3   : > { %v1006_v12 = vpack.c.b16 %v1005_v11, %v1004_v10 }
 0x4a5   : > { %862 = vrot.lane.b32.xlu2 %v858_v56, %s1856_s24  ;;  %1007 = vrot.lane.b32.xlu1 %v1006_v12, %s1855_s23 }
 0x4ad   : > { %995 = vrot.lane.b32.xlu2 %v991_v8, %s1855_s23  ;;  %864 = vrot.lane.b32.xlu1 %v859_v60, %s1856_s24 }
 0x4af   : > { %v694_v17 = vpop.xlane.xlu2 %693 }
 0x4b0   : > { %v698_v14 = vmax.f32 %v694_v17, 1e-30 }
 0x4b2   : > { %1736 = vrcp.f32 %v698_v14  ;;  %v711_v23 = vand.u32 2147483648, %v698_v14  ;;  %v709_v27 = vand.u32 2147483647, %v698_v14  ;;  %vm705_vm1 = vweird.f32 %v698_v14 }
 0x4b4   : > { %v712_v32 = vor.u32 1.1754944e-38, %v711_v23  ;;  %vm710_vm3 = vcmp.eq.f32.partialorder %v709_v27, 8.507059e+37  ;;  %v1708_v27 = vld [vmem:[%s2354_s6] ss:$0 sm:$0xff] }
 0x4b5   : > { %997 = vrot.lane.b32.xlu1 %v992_v9, %s1855_s23  ;;  %s1774_s23 = scalar_lea.hbm %s2357_s9, 64 }
 0x4b7   : > { %v1088_v29 = vpop.xlane.xlu2 %1087  ;;  %v697_v18 = vpop.xlane.xlu1 %696 }
 0x4b8   : > { %v1737_v15 = vpop.eup %1736  ;;  %v1092_v16 = vmax.f32 %v1088_v29, 1e-30  ;;  %v699_v20 = vmax.f32 %v697_v18, 1e-30 }
 0x4b9   : > { %v701_v19 = vmul.f32 %v1737_v15, %v698_v14  ;;  %vm706_vm15 = vweird.f32 %v1737_v15 }
 0x4ba   : > { %1738 = vrcp.f32 %v1092_v16  ;;  %vm707_vm2 = vmor %vm705_vm1, %vm706_vm15  ;;  %v726_v46 = vand.u32 2147483648, %v699_v20  ;;  %v724_v49 = vand.u32 2147483647, %v699_v20  ;;  %vm1099_vm7 = vweird.f32 %v1092_v16 }
 0x4bb   : > { %v702_v22 = vsub.f32 1.0, %v701_v19  ;;  %1740 = vrcp.f32 %v699_v20  ;;  %v1105_v30 = vand.u32 2147483648, %v1092_v16  ;;  %vm720_vm8 = vweird.f32 %v699_v20  ;;  %v1643_v19 = vld [vmem:[%s2355_s7 + $0x8] sm:$0xff] }
 0x4bc   : > { %v1103_v51 = vand.u32 2147483647, %v1092_v16  ;;  %v727_v56 = vor.u32 1.1754944e-38, %v726_v46  ;;  %vm725_vm12 = vcmp.eq.f32.partialorder %v724_v49, 8.507059e+37  ;;  %1213 = vmatpush.bf16.msrb.mxu2 %v1643_v19 }
 0x4bd   : > { %v703_v25 = vmul.f32 %v1737_v15, %v702_v22  ;;  %v1106_v57 = vor.u32 1.1754944e-38, %v1105_v30 }
 0x4be   : > { %vm1104_vm13 = vcmp.eq.f32.partialorder %v1103_v51, 8.507059e+37 }
 0x4bf   : > { %v704_v28 = vadd.f32 %v1737_v15, %v703_v25  ;;  %v1091_v33 = vpop.xlane.xlu1 %1090 }
 0x4c0   : > { %v1739_v31 = vpop.eup %1738  ;;  %v1093_v37 = vmax.f32 %v1091_v33, 1e-30 }
 0x4c1   : > { %v1741_v34 = vpop.eup %1740  ;;  %v1095_v36 = vmul.f32 %v1739_v31, %v1092_v16  ;;  %v708_v7 = vsel %vm707_vm2, %v1737_v15, %v704_v28  ;;  %vm1100_vm5 = vweird.f32 %v1739_v31 }
 0x4c2   : > { %v716_v26 = vmul.f32 %v1741_v34, %v699_v20  ;;  %v713_v39 = vsel %vm710_vm3, %v712_v32, %v708_v7  ;;  %1742 = vrcp.f32 %v1093_v37  ;;  %vm721_vm6 = vweird.f32 %v1741_v34  ;;  %vm2159_vm9 = vmor %vm1099_vm7, %vm1100_vm5  ;;  %v1642_v20 = vld [vmem:[%s2355_s7] sm:$0xff] }
 0x4c3   : > { %v1096_v40 = vsub.f32 1.0, %v1095_v36  ;;  %v714_v41 = vmul.f32 %v2124_v59, %v713_v39  ;;  %vm722_vm10 = vmor %vm720_vm8, %vm721_vm6  ;;  %v1120_v62 = vand.u32 2147483648, %v1093_v37  ;;  %v1118_v3 = vand.u32 2147483647, %v1093_v37  ;;  %1214 = vmatpush.bf16.msrb.mxu2 %v1642_v20  ;;  %v2208_v59 = vld [vmem:[%s2354_s6 + $0x1] ss:$0 sm:$0xff] }
 0x4c4   : > { %v717_v43 = vsub.f32 1.0, %v716_v26  ;;  %vm1114_vm15 = vweird.f32 %v1093_v37 }
 0x4c5   : > { %v1097_v21 = vmul.f32 %v1739_v31, %v1096_v40  ;;  %v730_v47 = vpack.c.bf16 %v714_v41, %v714_v41  ;;  %v1121_v8 = vor.u32 1.1754944e-38, %v1120_v62  ;;  %vm1119_vm2 = vcmp.eq.f32.partialorder %v1118_v3, 8.507059e+37 }
 0x4c6   : > { %v718_v48 = vmul.f32 %v1741_v34, %v717_v43 }
 0x4c7   : > { %733 = vst.msk [vmem:[%s2155_s27] sm:$0xf] %vm732_vm4, %v730_v47  ;;  %v1098_v53 = vadd.f32 %v1739_v31, %v1097_v21  ;;  %v737_v4 = vunpack.c.l.b16 %v730_v47 }
 0x4c8   : > { %v719_v50 = vadd.f32 %v1741_v34, %v718_v48  ;;  %v1743_v52 = vpop.eup %1742 }
 0x4c9   : > { %v1110_v13 = vmul.f32 %v1743_v52, %v1093_v37  ;;  %v1102_v55 = vsel %vm2159_vm9, %v1739_v31, %v1098_v53  ;;  %vm1115_vm14 = vweird.f32 %v1743_v52  ;;  %v1858_v53 = vmov 16.0  }
 0x4ca   : > { %v723_v54 = vsel %vm722_vm10, %v1741_v34, %v719_v50  ;;  %v1107_v0 = vsel %vm1104_vm13, %v1106_v57, %v1102_v55  ;;  %vm1116_vm1 = vmor %vm1114_vm15, %vm1115_vm14  ;;  %1744 = vrcp.f32 %v1858_v53 }
 0x4cb   : > { %v728_v58 = vsel %vm725_vm12, %v727_v56, %v723_v54  ;;  %v1111_v60 = vsub.f32 1.0, %v1110_v13  ;;  %v1108_v24 = vmul.f32 %v2106_v35, %v1107_v0 }
 0x4cc   : > { %v729_v61 = vmul.f32 %v2128_v63, %v728_v58 }
 0x4cd   : > { %v1112_v2 = vmul.f32 %v1743_v52, %v1111_v60  ;;  %v1124_v12 = vpack.c.bf16 %v1108_v24, %v1108_v24 }
 0x4ce   : > { %v731_v1 = vpack.c.bf16 %v729_v61, %v729_v61 }
 0x4cf   : > { %v1113_v6 = vadd.f32 %v1743_v52, %v1112_v2  ;;  %v1137_v35 = vunpack.c.l.b16 %v1124_v12 }
 0x4d0   : > { %734 = vst.msk [vmem:[%s2155_s27 + $0x4] sm:$0xf] %vm732_vm4, %v731_v1  ;;  %v738_v5 = vunpack.c.l.b16 %v731_v1  ;;  %v1745_v51 = vpop.eup %1744 }
 0x4d1   : > { %v1117_v10 = vsel %vm1116_vm1, %v1743_v52, %v1113_v6  ;;  %v1246_v56 = vmul.f32 16.0, %v1745_v51 }
 0x4d2   : > { %v739_v9 = vpack.c.b16 %v738_v5, %v737_v4  ;;  %v1122_v63 = vsel %vm1119_vm2, %v1121_v8, %v1117_v10 }
 0x4d3   : > { %v1123_v11 = vmul.f32 %v2111_v38, %v1122_v63  ;;  %v1247_v58 = vsub.f32 1.0, %v1246_v56 }
 0x4d4   : > { %1605 = vmatmul.msk.bf16.vlgmr.msrb.gmra.mxu3 %vm679_vm11, %v739_v9 }
 0x4d5   : > { %1158 = vmatpush.bf16.msrb.mxu3 %v1146_v45  ;;  %v1125_v17 = vpack.c.bf16 %v1123_v11, %v1123_v11  ;;  %v1248_v62 = vmul.f32 %v1745_v51, %v1247_v58 }
 0x4d7   : > { %1130 = vrot.lane.b32.xlu2 %v1125_v17, %s1857_s25  ;;  %v1138_v14 = vunpack.c.l.b16 %v1125_v17  ;;  %v1249_v2 = vadd.f32 %v1745_v51, %v1248_v62 }
 0x4d9   : > { %v1139_v29 = vpack.c.b16 %v1138_v14, %v1137_v35 }
 0x4db   : > { %1140 = vrot.lane.b32.xlu0 %v1139_v29, %s1857_s25 }
 0x4e3   : > { %1128 = vrot.lane.b32.xlu0 %v1124_v12, %s1857_s25  ;;  %s1460_s25 = scalar_lea.hbm %s2357_s9, %s1646_s21 }
 0x4e4   : > { %s1463_s29 = sshll.u32 %s1460_s25, 4  ;;  %s1464_s29 = int_to_ptr.hbm [resolvable:$true] %s1463_s29 }
 0x4e5   : > { %s1768_s14 = sshra.s32 %s1464_s29, 4  ;;  %s1769_s14 = int_to_ptr.hbm [resolvable:$true] %s1768_s14 }
 0x4e6   : > { %p1775_p0 = scmp.lt.s32.totalorder %s1769_s14, %s2357_s9 }
 0x4f7   : > { %v875_v15 = vpop.permute.xlu2 %874 }
 0x4f8   : > { %1608 = vmatmul.msk.bf16.vlgmr.msra.gmra.mxu3 %vm679_vm11, %v875_v15 }
 0x4ff   : > { %v863_v38 = vpop.permute.xlu2 %862 }
 0x500   : > { %1606 = vst.msk [vmem:[%s2155_s27 + $0x8] sm:$0xf] %vm732_vm4, %v863_v38 }
 0x507   : > { %v996_v42 = vpop.permute.xlu2 %995 }
 0x508   : > { %1609 = vst.msk [vmem:[%s2155_s27 + $0x10] sm:$0xf] %vm732_vm4, %v996_v42 }
 0x517   : > { %v1008_v44 = vpop.permute.xlu1 %1007 }
 0x518   : > { %1611 = vmatmul.msk.bf16.vlgmr.msra.gmra.mxu2 %vm679_vm11, %v1008_v44 }
 0x51f   : > { %v865_v45 = vpop.permute.xlu1 %864 }
 0x520   : > { %1607 = vst.msk [vmem:[%s2155_s27 + $0xc] sm:$0xf] %vm732_vm4, %v865_v45 }
 0x527   : > { %v998_v16 = vpop.permute.xlu1 %997 }
 0x528   : > { %1610 = vst.msk [vmem:[%s2155_s27 + $0x14] sm:$0xf] %vm732_vm4, %v998_v16 }
 0x531   : > { %v1131_v18 = vpop.permute.xlu2 %1130 }
 0x532   : > { %1613 = vst.msk [vmem:[%s2155_s27 + $0x1c] sm:$0xf] %vm732_vm4, %v1131_v18 }
 0x54d   : > { %v1141_v22 = vpop.permute.xlu0 %1140 }
 0x54e   : > { %1614 = vmatmul.msk.bf16.vlgmr.msrb.gmra.mxu3 %vm679_vm11, %v1141_v22  ;;  %vm1250_vm11 = vweird.f32 %v1745_v51 }
 0x54f   : > { %v2214_v5 = vsel %vm1250_vm11, %v1745_v51, %v1249_v2 }
 0x555   : > { %v1129_v23 = vpop.permute.xlu0 %1128 }
 0x556   : > { %1612 = vst.msk [vmem:[%s2155_s27 + $0x18] sm:$0xf] %vm732_vm4, %v1129_v23  ;;  %s1770_s27 = scalar_lea.hbm %s1769_s14, 32 }
 0x557   : > { %v758_v25 = vpop.f32.mrf.mxu3  ;;  %p1771_p11 = scmp.ne.s32.totalorder %s1769_s14, %s1770_s27  ;;  %p1776_p1 = scmp.lt.s32.totalorder %s1774_s23, %s1770_s27 }
 0x558   : > { %v1166_v31 = vadd.f32 %v1708_v27, %v758_v25 }
 0x559   : > { %p1772_p12 = pnand %p1771_p11, %p1951_p5  ;;  %p1777_p2 = por %p1776_p1, %p1775_p0 }
 0x55b   : > { %p1773_p13 = pneg %p1772_p12 }
 0x55d   : > { %p1778_p3 = pnand %p1777_p2, %p1773_p13 }
 0x55f   : > { %v760_v28 = vpop.f32.mrf.mxu3 }
 0x560   : > { %v1167_v32 = vadd.f32 %v1708_v27, %v760_v28 }
 0x562   : > { %v1174_v33 = vpack.c.bf16 %v1167_v32, %v1166_v31 }
 0x564   : > { %1623 = vmatmul.msk.bf16.vlgmr.msrb.gmra.mxu2 %vm395_vm0, %v1174_v33 }
 0x57b   : > { %v894_v34 = vpop.f32.mrf.mxu3 }
 0x57c   : > { %v1168_v37 = vadd.f32 %v1708_v27, %v894_v34 }
 0x583   : > { %v896_v36 = vpop.f32.mrf.mxu3 }
 0x584   : > { %v1169_v7 = vadd.f32 %v1708_v27, %v896_v36 }
 0x586   : > { %v1175_v26 = vpack.c.bf16 %v1169_v7, %v1168_v37 }
 0x588   : > { %1624 = vmatmul.msk.bf16.gmra.mxu2 %vm395_vm0, %v1175_v26 }
 0x59b   : > { %v1027_v39 = vpop.f32.mrf.mxu2 }
 0x59c   : > { %v1170_v41 = vadd.f32 %v1708_v27, %v1027_v39  ;;  %v2227_v39 = vld [vmem:[%s2354_s6 + $0x2] ss:$0 sm:$0xff] }
 0x5a3   : > { %v1029_v40 = vpop.f32.mrf.mxu2 }
 0x5a4   : > { %v1171_v43 = vadd.f32 %v1708_v27, %v1029_v40 }
 0x5a6   : > { %v1176_v21 = vpack.c.bf16 %v1171_v43, %v1170_v41 }
 0x5a8   : > { %1625 = vmatmul.msk.bf16.gmra.mxu2 %vm395_vm0, %v1176_v21 }
 0x5d1   : > { %v1160_v46 = vpop.f32.mrf.mxu3 }
 0x5d2   : > { %v1172_v48 = vadd.f32 %v1708_v27, %v1160_v46 }
 0x5d9   : > { %v1162_v47 = vpop.f32.mrf.mxu3 }
 0x5da   : > { %v1173_v49 = vadd.f32 %v1708_v27, %v1162_v47 }
 0x5dc   : > { %v1177_v30 = vpack.c.bf16 %v1173_v49, %v1172_v48  ;;  %v2239_v49 = vld [vmem:[%s2354_s6 + $0x3] ss:$0 sm:$0xff] }
 0x5de   : > { %1626 = vmatmul.msk.bf16.gmra.mxu2 %vm395_vm0, %v1177_v30 }
 0x5e7   : > { %v1216_v50 = vpop.f32.mrf.mxu2 }
 0x5e8   : > { %v1217_v52 = vadd.f32 %v2208_v59, %v1216_v50 }
 0x5ea   : > { %v1236_v55 = vsel %vm395_vm0, %v1217_v52, 0.0 }
 0x5ef   : > { %v1218_v13 = vpop.f32.mrf.mxu2 }
 0x5f0   : > { %v1219_v54 = vadd.f32 %v2208_v59, %v1218_v13 }
 0x5f2   : > { %v1237_v57 = vsel %vm395_vm0, %v1219_v54, 0.0 }
 0x5f3   : > { %v1238_v60 = vadd.f32 %v1237_v57, %v1236_v55 }
 0x5f5   : > { %v1239_v61 = vrot.slane %v1238_v60, 4 }
 0x5f7   : > { %v1240_v0 = vadd.f32 %v1239_v61, %v1238_v60 }
 0x5f9   : > { %v1241_v1 = vrot.slane %v1240_v0, 2 }
 0x5fb   : > { %v1242_v3 = vadd.f32 %v1241_v1, %v1240_v0 }
 0x5fd   : > { %v1243_v4 = vrot.slane %v1242_v3, 1 }
 0x5ff   : > { %v1244_v6 = vadd.f32 %v1243_v4, %v1242_v3 }
 0x601   : > { %v1252_v24 = vmul.f32 %v2214_v5, %v1244_v6 }
 0x603   : > { %v1253_v8 = vsub.f32 %v1217_v52, %v1252_v24  ;;  %v1254_v9 = vsub.f32 %v1219_v54, %v1252_v24 }
 0x605   : > { %v1255_v10 = vmul.f32 %v1253_v8, %v1253_v8  ;;  %v1256_v63 = vmul.f32 %v1254_v9, %v1254_v9  ;;  %v1268_v47 = vmul.f32 %v2227_v39, %v1253_v8  ;;  %v1269_v48 = vmul.f32 %v2227_v39, %v1254_v9 }
 0x607   : > { %v1257_v11 = vsel %vm395_vm0, %v1255_v10, 0.0  ;;  %v1258_v12 = vsel %vm395_vm0, %v1256_v63, 0.0 }
 0x608   : > { %v1259_v17 = vadd.f32 %v1258_v12, %v1257_v11 }
 0x60a   : > { %v1260_v35 = vrot.slane %v1259_v17, 4 }
 0x60b   : > { %v1221_v29 = vpop.f32.mrf.mxu2 }
 0x60c   : > { %v1261_v14 = vadd.f32 %v1260_v35, %v1259_v17  ;;  %v1222_v44 = vadd.f32 %v2208_v59, %v1221_v29 }
 0x60e   : > { %v1262_v15 = vrot.slane %v1261_v14, 2  ;;  %v1288_v20 = vsel %vm395_vm0, %v1222_v44, 0.0 }
 0x610   : > { %v1263_v38 = vadd.f32 %v1262_v15, %v1261_v14 }
 0x612   : > { %v1264_v42 = vrot.slane %v1263_v38, 1 }
 0x613   : > { %v1223_v16 = vpop.f32.mrf.mxu2 }
 0x614   : > { %v1265_v45 = vadd.f32 %v1264_v42, %v1263_v38  ;;  %v1224_v18 = vadd.f32 %v2208_v59, %v1223_v16 }
 0x616   : > { %v1266_v19 = vmul.f32 %v1265_v45, %v2214_v5  ;;  %v1289_v22 = vsel %vm395_vm0, %v1224_v18, 0.0 }
 0x617   : > { %v1290_v25 = vadd.f32 %v1289_v22, %v1288_v20 }
 0x618   : > { %v1270_v23 = vadd.f32 1e-05, %v1266_v19 }
 0x619   : > { %v1291_v27 = vrot.slane %v1290_v25, 4 }
 0x61a   : > { %1746 = vrsqrt.f32 %v1270_v23  ;;  %vm1277_vm4 = vweird.f32 %v1270_v23 }
 0x61b   : > { %v1292_v28 = vadd.f32 %v1291_v27, %v1290_v25 }
 0x61d   : > { %v1293_v31 = vrot.slane %v1292_v28, 2 }
 0x61f   : > { %v1294_v33 = vadd.f32 %v1293_v31, %v1292_v28 }
 0x620   : > { %v1747_v32 = vpop.eup %1746 }
 0x621   : > { %v1272_v34 = vmul.f32 %v1747_v32, %v1270_v23  ;;  %v1295_v36 = vrot.slane %v1294_v33, 1  ;;  %vm1278_vm3 = vweird.f32 %v1747_v32 }
 0x622   : > { %vm1279_vm5 = vmor %vm1277_vm4, %vm1278_vm3 }
 0x623   : > { %v1273_v37 = vmul.f32 %v1747_v32, %v1272_v34  ;;  %v1296_v7 = vadd.f32 %v1295_v36, %v1294_v33 }
 0x625   : > { %v1274_v26 = vmul.f32 0.5, %v1273_v37  ;;  %v1297_v40 = vmul.f32 %v1296_v7, %v2214_v5 }
 0x627   : > { %v1275_v41 = vsub.f32 1.5, %v1274_v26  ;;  %v2230_v43 = vsub.f32 %v1222_v44, %v1297_v40  ;;  %v2232_v21 = vsub.f32 %v1224_v18, %v1297_v40 }
 0x629   : > { %v1276_v46 = vmul.f32 %v1747_v32, %v1275_v41  ;;  %v1300_v30 = vmul.f32 %v2230_v43, %v2230_v43  ;;  %v1301_v53 = vmul.f32 %v2232_v21, %v2232_v21 }
 0x62b   : > { %v1280_v50 = vsel %vm1279_vm5, %v1747_v32, %v1276_v46  ;;  %v1302_v56 = vsel %vm395_vm0, %v1300_v30, 0.0  ;;  %v1303_v13 = vsel %vm395_vm0, %v1301_v53, 0.0  ;;  %v1226_v54 = vpop.f32.mrf.mxu2 }
 0x62c   : > { %v1281_v51 = vmul.f32 %v1280_v50, %v1268_v47  ;;  %v1282_v52 = vmul.f32 %v1280_v50, %v1269_v48  ;;  %v1304_v55 = vadd.f32 %v1303_v13, %v1302_v56  ;;  %v1227_v2 = vadd.f32 %v2208_v59, %v1226_v54 }
 0x62e   : > { %v1284_v57 = vadd.f32 %v2239_v49, %v1281_v51  ;;  %v1285_v58 = vadd.f32 %v2239_v49, %v1282_v52  ;;  %v1305_v60 = vrot.slane %v1304_v55, 4  ;;  %v1331_v8 = vsel %vm395_vm0, %v1227_v2, 0.0 }
 0x630   : > { %v1286_v61 = vmax.f32 %v1284_v57, 0.0  ;;  %v1287_v62 = vmax.f32 %v1285_v58, 0.0  ;;  %v1306_v0 = vadd.f32 %v1305_v60, %v1304_v55 }
 0x632   : > { %1417 = vst.msk [vmem:[%s2250_s17] sm:$0xff] %vm395_vm0, %v1286_v61  ;;  %v1307_v1 = vrot.slane %v1306_v0, 2 }
 0x633   : > { %1418 = vst.msk [vmem:[%s2250_s17 + $0x8] sm:$0xff] %vm395_vm0, %v1287_v62  ;;  %v1228_v3 = vpop.f32.mrf.mxu2 }
 0x634   : > { %v1308_v4 = vadd.f32 %v1307_v1, %v1306_v0  ;;  %v1229_v6 = vadd.f32 %v2208_v59, %v1228_v3 }
 0x636   : > { %v1309_v24 = vrot.slane %v1308_v4, 1  ;;  %v1332_v9 = vsel %vm395_vm0, %v1229_v6, 0.0 }
 0x637   : > { %1781 = shalt.err (!%p1778_p3)
}
 0x638   : > { %s1859_s0 = smov 64   ;;  %s1860_s1 = smov 4   ;;  %v1333_v10 = vadd.f32 %v1332_v9, %v1331_v8  ;;  %v1310_v63 = vadd.f32 %v1309_v24, %v1308_v4  ;;  %v1312_v33 = vmul.f32 %v2227_v39, %v2230_v43  ;;  %v1313_v34 = vmul.f32 %v2227_v39, %v2232_v21 }
 0x639   : > { %1648 = dma.vmem_to_hbm [thread:$0]  (%p1951_p5), %s1462_s22, 512, %s1464_s29, %s1431_s28, %s1859_s0, %s1859_s0, %s1860_s1  }
 0x63a   : > { %v1334_v11 = vrot.slane %v1333_v10, 4  ;;  %v1311_v12 = vmul.f32 %v1310_v63, %v2214_v5  ;;  %s1644_s0 = sshll.u32 %s1934_s13, 6  ;;  %s1443_s28 = sshll.u32 %s2250_s17, 4  ;;  %s1444_s28 = int_to_ptr.vmem [resolvable:$true] %s1443_s28 }
 0x63b   : > { %s1442_s29 = scalar_lea.hbm %s2356_s8, %s1644_s0  ;;  %s1426_s14 = scalar_lea.sflag [#allocation3], %s2151_s26 }
 0x63c   : > { %v1335_v17 = vadd.f32 %v1334_v11, %v1333_v10  ;;  %v1314_v35 = vadd.f32 1e-05, %v1311_v12  ;;  %s1445_s13 = sshll.u32 %s1442_s29, 4  ;;  %s1802_s24 = scalar_lea.hbm %s2356_s8, 128  ;;  %s1446_s13 = int_to_ptr.hbm [resolvable:$true] %s1445_s13 }
 0x63d   : > { %s1796_s27 = sshra.s32 %s1446_s13, 4  ;;  %s1797_s27 = int_to_ptr.hbm [resolvable:$true] %s1796_s27 }
 0x63e   : > { %v1336_v14 = vrot.slane %v1335_v17, 2  ;;  %1748 = vrsqrt.f32 %v1314_v35  ;;  %vm1321_vm7 = vweird.f32 %v1314_v35  ;;  %s1798_s16 = scalar_lea.hbm %s1797_s27, 64  ;;  %p1803_p9 = scmp.lt.s32.totalorder %s1797_s27, %s2356_s8 }
 0x63f   : > { %p1799_p4 = scmp.ne.s32.totalorder %s1797_s27, %s1798_s16  ;;  %p1804_p10 = scmp.lt.s32.totalorder %s1802_s24, %s1798_s16 }
 0x640   : > { %v1337_v29 = vadd.f32 %v1336_v14, %v1335_v17 }
 0x641   : > { %p1800_p7 = pnand %p1799_p4, %p1951_p5  ;;  %p1805_p11 = por %p1804_p10, %p1803_p9 }
 0x642   : > { %v1338_v15 = vrot.slane %v1337_v29, 1 }
 0x643   : > { %p1801_p8 = pneg %p1800_p7 }
 0x644   : > { %v1339_v38 = vadd.f32 %v1338_v15, %v1337_v29  ;;  %v1749_v42 = vpop.eup %1748 }
 0x645   : > { %v1316_v44 = vmul.f32 %v1749_v42, %v1314_v35  ;;  %vm1322_vm6 = vweird.f32 %v1749_v42  ;;  %p1806_p12 = pnand %p1805_p11, %p1801_p8 }
 0x646   : > { %v1340_v45 = vmul.f32 %v1339_v38, %v2214_v5  ;;  %vm1323_vm8 = vmor %vm1321_vm7, %vm1322_vm6 }
 0x647   : > { %v1317_v16 = vmul.f32 %v1749_v42, %v1316_v44 }
 0x648   : > { %v1341_v18 = vsub.f32 %v1227_v2, %v1340_v45  ;;  %v1342_v19 = vsub.f32 %v1229_v6, %v1340_v45 }
 0x649   : > { %v1318_v20 = vmul.f32 0.5, %v1317_v16 }
 0x64a   : > { %v1343_v22 = vmul.f32 %v1341_v18, %v1341_v18  ;;  %v1344_v23 = vmul.f32 %v1342_v19, %v1342_v19  ;;  %v1355_v3 = vmul.f32 %v2227_v39, %v1341_v18  ;;  %v1356_v4 = vmul.f32 %v2227_v39, %v1342_v19 }
 0x64b   : > { %v1319_v25 = vsub.f32 1.5, %v1318_v20 }
 0x64c   : > { %v1345_v27 = vsel %vm395_vm0, %v1343_v22, 0.0  ;;  %v1346_v28 = vsel %vm395_vm0, %v1344_v23, 0.0 }
 0x64d   : > { %v1347_v31 = vadd.f32 %v1346_v28, %v1345_v27  ;;  %v1320_v32 = vmul.f32 %v1749_v42, %v1319_v25 }
 0x64f   : > { %v1348_v36 = vrot.slane %v1347_v31, 4  ;;  %v1324_v37 = vsel %vm1323_vm8, %v1749_v42, %v1320_v32 }
 0x650   : > { %v1325_v7 = vmul.f32 %v1324_v37, %v1312_v33  ;;  %v1326_v26 = vmul.f32 %v1324_v37, %v1313_v34 }
 0x651   : > { %v1349_v40 = vadd.f32 %v1348_v36, %v1347_v31 }
 0x652   : > { %v1327_v41 = vadd.f32 %v2239_v49, %v1325_v7  ;;  %v1328_v46 = vadd.f32 %v2239_v49, %v1326_v26 }
 0x653   : > { %v1350_v47 = vrot.slane %v1349_v40, 2 }
 0x654   : > { %v1329_v48 = vmax.f32 %v1327_v41, 0.0  ;;  %v1330_v30 = vmax.f32 %v1328_v46, 0.0 }
 0x655   : > { %v1351_v53 = vadd.f32 %v1350_v47, %v1349_v40 }
 0x656   : > { %1419 = vst.msk [vmem:[%s2250_s17 + $0x10] sm:$0xff] %vm395_vm0, %v1329_v48 }
 0x657   : > { %v1352_v43 = vrot.slane %v1351_v53, 1  ;;  %1420 = vst.msk [vmem:[%s2250_s17 + $0x18] sm:$0xff] %vm395_vm0, %v1330_v30 }
 0x659   : > { %v1353_v21 = vadd.f32 %v1352_v43, %v1351_v53 }
 0x65b   : > { %v1354_v50 = vmul.f32 %v1353_v21, %v2214_v5 }
 0x65d   : > { %v1357_v51 = vadd.f32 1e-05, %v1354_v50 }
 0x65f   : > { %1750 = vrsqrt.f32 %v1357_v51  ;;  %vm1364_vm10 = vweird.f32 %v1357_v51 }
 0x661   : > { %v1231_v52 = vpop.f32.mrf.mxu2 }
 0x662   : > { %v1232_v55 = vadd.f32 %v2208_v59, %v1231_v52 }
 0x664   : > { %v1374_v62 = vsel %vm395_vm0, %v1232_v55, 0.0 }
 0x665   : > { %v1751_v56 = vpop.eup %1750 }
 0x666   : > { %v1359_v13 = vmul.f32 %v1751_v56, %v1357_v51  ;;  %vm1365_vm9 = vweird.f32 %v1751_v56 }
 0x667   : > { %vm1366_vm12 = vmor %vm1364_vm10, %vm1365_vm9 }
 0x668   : > { %v1360_v54 = vmul.f32 %v1751_v56, %v1359_v13 }
 0x669   : > { %v1233_v58 = vpop.f32.mrf.mxu2 }
 0x66a   : > { %v1361_v57 = vmul.f32 0.5, %v1360_v54  ;;  %v1234_v60 = vadd.f32 %v2208_v59, %v1233_v58 }
 0x66c   : > { %v1362_v61 = vsub.f32 1.5, %v1361_v57  ;;  %v1375_v0 = vsel %vm395_vm0, %v1234_v60, 0.0 }
 0x66d   : > { %v1376_v2 = vadd.f32 %v1375_v0, %v1374_v62 }
 0x66e   : > { %v1363_v1 = vmul.f32 %v1751_v56, %v1362_v61 }
 0x66f   : > { %v1377_v24 = vrot.slane %v1376_v2, 4 }
 0x670   : > { %v1367_v6 = vsel %vm1366_vm12, %v1751_v56, %v1363_v1 }
 0x671   : > { %v1368_v8 = vmul.f32 %v1367_v6, %v1355_v3  ;;  %v1369_v59 = vmul.f32 %v1367_v6, %v1356_v4  ;;  %v1378_v9 = vadd.f32 %v1377_v24, %v1376_v2 }
 0x673   : > { %v1370_v10 = vadd.f32 %v2239_v49, %v1368_v8  ;;  %v1371_v63 = vadd.f32 %v2239_v49, %v1369_v59  ;;  %v1379_v11 = vrot.slane %v1378_v9, 2 }
 0x675   : > { %v1372_v12 = vmax.f32 %v1370_v10, 0.0  ;;  %v1373_v17 = vmax.f32 %v1371_v63, 0.0  ;;  %v1380_v35 = vadd.f32 %v1379_v11, %v1378_v9 }
 0x677   : > { %1421 = vst.msk [vmem:[%s2250_s17 + $0x20] sm:$0xff] %vm395_vm0, %v1372_v12  ;;  %v1381_v14 = vrot.slane %v1380_v35, 1 }
 0x678   : > { %1422 = vst.msk [vmem:[%s2250_s17 + $0x28] sm:$0xff] %vm395_vm0, %v1373_v17 }
 0x679   : > { %v1382_v29 = vadd.f32 %v1381_v14, %v1380_v35 }
 0x67b   : > { %v1383_v15 = vmul.f32 %v1382_v29, %v2214_v5 }
 0x67d   : > { %v1384_v38 = vsub.f32 %v1232_v55, %v1383_v15  ;;  %v1385_v42 = vsub.f32 %v1234_v60, %v1383_v15 }
 0x67f   : > { %v1386_v44 = vmul.f32 %v1384_v38, %v1384_v38  ;;  %v1387_v45 = vmul.f32 %v1385_v42, %v1385_v42  ;;  %v1398_v40 = vmul.f32 %v2227_v39, %v1384_v38  ;;  %v1399_v41 = vmul.f32 %v2227_v39, %v1385_v42 }
 0x681   : > { %v1388_v16 = vsel %vm395_vm0, %v1386_v44, 0.0  ;;  %v1389_v18 = vsel %vm395_vm0, %v1387_v45, 0.0 }
 0x682   : > { %v1390_v19 = vadd.f32 %v1389_v18, %v1388_v16 }
 0x684   : > { %v1391_v20 = vrot.slane %v1390_v19, 4 }
 0x686   : > { %v1392_v22 = vadd.f32 %v1391_v20, %v1390_v19 }
 0x688   : > { %v1393_v23 = vrot.slane %v1392_v22, 2 }
 0x68a   : > { %v1394_v25 = vadd.f32 %v1393_v23, %v1392_v22 }
 0x68c   : > { %v1395_v27 = vrot.slane %v1394_v25, 1 }
 0x68e   : > { %v1396_v28 = vadd.f32 %v1395_v27, %v1394_v25 }
 0x690   : > { %v1397_v31 = vmul.f32 %v1396_v28, %v2214_v5 }
 0x692   : > { %v1400_v32 = vadd.f32 1e-05, %v1397_v31 }
 0x694   : > { %1752 = vrsqrt.f32 %v1400_v32  ;;  %vm1407_vm14 = vweird.f32 %v1400_v32 }
 0x69a   : > { %v1753_v33 = vpop.eup %1752 }
 0x69b   : > { %v1402_v34 = vmul.f32 %v1753_v33, %v1400_v32  ;;  %vm1408_vm13 = vweird.f32 %v1753_v33 }
 0x69c   : > { %vm1409_vm15 = vmor %vm1407_vm14, %vm1408_vm13 }
 0x69d   : > { %v1403_v36 = vmul.f32 %v1753_v33, %v1402_v34 }
 0x69f   : > { %v1404_v37 = vmul.f32 0.5, %v1403_v36 }
 0x6a1   : > { %v1405_v7 = vsub.f32 1.5, %v1404_v37 }
 0x6a3   : > { %v1406_v26 = vmul.f32 %v1753_v33, %v1405_v7 }
 0x6a5   : > { %v1410_v5 = vsel %vm1409_vm15, %v1753_v33, %v1406_v26 }
 0x6a6   : > { %v1411_v46 = vmul.f32 %v1410_v5, %v1398_v40  ;;  %v1412_v47 = vmul.f32 %v1410_v5, %v1399_v41 }
 0x6a8   : > { %v1413_v48 = vadd.f32 %v2239_v49, %v1411_v46  ;;  %v1414_v30 = vadd.f32 %v2239_v49, %v1412_v47 }
 0x6aa   : > { %v1415_v53 = vmax.f32 %v1413_v48, 0.0  ;;  %v1416_v43 = vmax.f32 %v1414_v30, 0.0 }
 0x6ac   : > { %1423 = vst.msk [vmem:[%s2250_s17 + $0x30] sm:$0xff] %vm395_vm0, %v1415_v53 }
 0x6ad   : > { %1424 = vst.msk [vmem:[%s2250_s17 + $0x38] sm:$0xff] %vm395_vm0, %v1416_v43 }
 0x6ae   : > { %1809 = shalt.err (!%p1806_p12)
}
 0x6af   : > { %s1861_s26 = smov 128   ;;  %s1862_s17 = smov 8  }
 0x6b0   : > { %1647 = dma.vmem_to_hbm [thread:$0]  (%p1951_p5), %s1444_s28, 1024, %s1446_s13, %s1426_s14, %s1861_s26, %s1861_s26, %s1862_s17  }
 0x6b1 PF: > { %p1658_p13 = scmp.ge.s32.totalorder %s1848_s12, 2  ;;  %s1478_s1 = sand.u32 1, %s1836_s30  }
 0x6b2   : > { %s1479_s22 = scalar_lea.sflag [#allocation3], %s1478_s1 }
 0x6b3   : > { %p1652_p0 = pnand %p1658_p13, %p1955_p6 }
 0x6b5   : > { %p1653_p1 = pneg %p1652_p0 }
 0x6b7   : > { %1827 = dma.done.wait (%p1653_p1), %s1479_s22, 1024  }
 0x6b8   : > { %1829 = vsyncadd (%p1653_p1), %s1479_s22, 4294966272  ;;  %s1489_s29 = scalar_lea.sflag [#allocation5], %s1478_s1 }
 0x6b9   : > { %1831 = dma.done.wait (%p1653_p1), %s1489_s29, 512  }
 0x6ba   : > { %1833 = vsyncadd (%p1653_p1), %s1489_s29, 4294966784  ;;  %p23_p5 = scmp.ge.s32.totalorder %s1938_s15, 4   ;;  %s2368_s30 = smov %s1840_s10 }
 0x6bb   : > { %s2369_s10 = smov %s1844_s11  ;;  %s2370_s11 = smov %s1949_s18 }
 0x6bc   : > { %s2371_s12 = smov %s1938_s15  ;;  %25 = sbr.rel (!%p23_p5) target bundleno = 8 (0x8), region = 107 }
 0x6c1   :  { %1495 = vsyncpa [#allocation3], 1 }
 0x6c2   :  { %1497 = vsyncpa [#allocation3 + $0x1], 1 }
 0x6c3   :  { %1498 = vsyncpa [#allocation5], 1 }
 0x6c4   :  { %1500 = vsyncpa [#allocation5 + $0x1], 1 }

</bundles_post_ra>
